<compile_context>
chip_gen: v5e
topology: v5e:2x2
jax: 0.10.0
libtpu: 0.0.40
codegen_flags: <defaults>
</compile_context>

<pallas_src>
import functools
import math

import jax
import jax.numpy as jnp
from jax.experimental import pallas as pl
from jax.experimental.pallas import tpu as pltpu


# --------------------------------------------------------------------------- #
# Parameter packing (done once, not per forward call)
# --------------------------------------------------------------------------- #
def pack_params(params, num_heads, matmul_dtype=None):
    """Pack per-query/key/value projections into one matrix, fold the softmax
    scale into the q columns, and build the segment-sum constant."""
    E = params["wk"].shape[0]
    H = num_heads
    D = E // H
    NQ = params["wq"].shape[0]
    scale = 1.0 / math.sqrt(D)
    cdt = matmul_dtype if matmul_dtype is not None else jnp.float32

    wq = params["wq"] * scale                      # (NQ, E, E) scale folded in
    bq = params["bq"] * scale                      # (NQ, 1, E)
    w_qkv = jnp.concatenate([wq[i] for i in range(NQ)]
                            + [params["wk"], params["wv"]], axis=1)   # (E,(NQ+2)E)
    b_qkv = jnp.concatenate([bq[i] for i in range(NQ)]
                            + [params["bk"], params["bv"]], axis=1)   # (1,(NQ+2)E)

    # seg (E, H): seg[g*D + d, g'] = (g == g')  -> segment-sum over each head's D block
    e_idx = jnp.arange(E)
    seg = (e_idx[:, None] // D == jnp.arange(H)[None, :]).astype(cdt)

    return dict(
        wqkv=w_qkv.astype(cdt),
        bqkv=b_qkv.astype(jnp.float32),            # bias added in f32 after accum
        seg=seg,
        wo=params["wo"].astype(cdt),
        bo=params["bo"].astype(jnp.float32),
        num_queries=NQ,
    )


# --------------------------------------------------------------------------- #
# Core kernel: packed q/k/v projection + head-axis attention (summed over NQ)
# --------------------------------------------------------------------------- #
def _mqa_core_kernel(x_ref, wqkv_ref, bqkv_ref, seg_ref, o_ref, *,
                     num_queries, num_heads, head_dim):
    """x_ref    : (1, T, E)          activation tile (T tokens of one batch)
       wqkv_ref : (E, (NQ+2)*E)      packed [q_0..q_{NQ-1} | k | v] weights (resident)
       bqkv_ref : (1, (NQ+2)*E)      packed biases, f32 (resident)
       seg_ref  : (E, H)             segment-sum constant (resident)
       o_ref    : (1, H, T, D)       per-head outputs, torch (B,H,S,D) layout
    """
    H, D, NQ = num_heads, head_dim, num_queries
    E = H * D
    T = x_ref.shape[1]

    x = x_ref[0]                                                        # (T, E)
    # One big MXU matmul for all NQ+2 projections, f32 accumulation.
    proj = jnp.dot(x, wqkv_ref[...],
                   preferred_element_type=jnp.float32) + bqkv_ref[...]  # (T,(NQ+2)E)

    k = proj[:, NQ * E:(NQ + 1) * E]                                    # (T, E)
    v = proj[:, (NQ + 1) * E:(NQ + 2) * E]                              # (T, E)
    seg = seg_ref[...]                                                  # (E, H)

    for h in range(H):
        acc_h = jnp.zeros((T, D), jnp.float32)
        for i in range(NQ):
            # q for query-projection i, head h (scale already folded into weights)
            q_h = proj[:, i * E + h * D: i * E + (h + 1) * D]           # (T, D)
            # Lane-block replication on the VPU/XLU (replaces the `spread` matmul).
            q_rep = jnp.tile(q_h, (1, H))                               # (T, E)
            # Genuine contraction: segment-sum each D block -> scores vs all key heads.
            scores = jnp.dot((q_rep * k).astype(seg.dtype), seg,
                             preferred_element_type=jnp.float32)        # (T, H)
            scores = scores - jnp.max(scores, axis=-1, keepdims=True)
            p = jnp.exp(scores)
            probs = p / jnp.sum(p, axis=-1, keepdims=True)              # exact divide
            # Prob-weighted value sum: H natural-cost broadcast FMAs on the VPU
            # (replaces the `expand` + `fold` matmuls).
            o_h = probs[:, 0:1] * v[:, 0:D]
            for g in range(1, H):
                o_h = o_h + probs[:, g:g + 1] * v[:, g * D:(g + 1) * D]
            acc_h = acc_h + o_h
        o_ref[0, h] = acc_h.astype(o_ref.dtype)


# --------------------------------------------------------------------------- #
# Output projection kernel (row-tiled over B*S)
# --------------------------------------------------------------------------- #
def _out_proj_kernel(y_ref, w_ref, b_ref, o_ref):
    o_ref[...] = (jnp.dot(y_ref[...], w_ref[...],
                          preferred_element_type=jnp.float32)
                  + b_ref[...]).astype(o_ref.dtype)


# --------------------------------------------------------------------------- #
# Wrapper
# --------------------------------------------------------------------------- #
def multi_query_attention(x, packed, num_heads, *, seq_tile=512, row_tile=512):
    B, S, E = x.shape
    H = num_heads
    D = E // H
    assert D * H == E, "embed_dim must be divisible by num_heads"
    NQ = packed["num_queries"]

    cdt = packed["wqkv"].dtype                    # compute (matmul) dtype
    x_in = x if x.dtype == cdt else x.astype(cdt)

    # ---- sequence tile (must divide S; keep (8,128) block rule satisfied) ----
    ts = math.gcd(min(seq_tile, S), S)
    if ts % 8 and ts != S:
        ts = S
    grid1 = (B, S // ts)

    core_cost = pl.CostEstimate(
        flops=int(2 * B * S * E * (NQ + 2) * E      # packed projection
                  + 2 * B * S * E * NQ * H * H      # seg contractions
                  + 4 * B * S * E * NQ * H),        # VPU tile/mul/FMA work
        transcendentals=int(B * S * NQ * H * H),
        bytes_accessed=int(jnp.dtype(cdt).itemsize
                           * (2 * B * S * E + (NQ + 2) * E * E)
                           + 4 * (NQ + 2) * E))

    core = pl.pallas_call(
        functools.partial(_mqa_core_kernel,
                          num_queries=NQ, num_heads=H, head_dim=D),
        out_shape=jax.ShapeDtypeStruct((B, H, S, D), cdt),
        grid_spec=pltpu.PrefetchScalarGridSpec(
            num_scalar_prefetch=0,
            grid=grid1,
            in_specs=[
                pl.BlockSpec((1, ts, E), lambda b, s: (b, s, 0)),
                pl.BlockSpec((E, (NQ + 2) * E), lambda b, s: (0, 0)),    # resident
                pl.BlockSpec((1, (NQ + 2) * E), lambda b, s: (0, 0)),    # resident
                pl.BlockSpec((E, H), lambda b, s: (0, 0)),               # resident
            ],
            out_specs=pl.BlockSpec((1, H, ts, D), lambda b, s: (b, 0, s, 0)),
        ),
        compiler_params=pltpu.CompilerParams(
            dimension_semantics=("parallel", "parallel"),
            vmem_limit_bytes=48 * 1024 * 1024),
        cost_estimate=core_cost,
    )(x_in, packed["wqkv"], packed["bqkv"], packed["seg"])

    # torch: attention_output.transpose(1,2).contiguous().view(B, S, E).
    # `core` is already in (B, H, S, D) memory order, so this reshape is a free
    # reinterpretation (no HBM pass); dtype is already the matmul dtype.
    y = core.reshape(B * S, E)

    n_rows = B * S
    tm = math.gcd(min(row_tile, n_rows), n_rows)
    if tm % 8 and tm != n_rows:
        tm = n_rows

    proj_cost = pl.CostEstimate(
        flops=int(2 * n_rows * E * E),
        transcendentals=0,
        bytes_accessed=int(jnp.dtype(cdt).itemsize * (n_rows * E + E * E)
                           + 4 * (n_rows * E + E)))

    out = pl.pallas_call(
        _out_proj_kernel,
        out_shape=jax.ShapeDtypeStruct((n_rows, E), jnp.float32),
        grid_spec=pltpu.PrefetchScalarGridSpec(
            num_scalar_prefetch=0,
            grid=(n_rows // tm,),
            in_specs=[
                pl.BlockSpec((tm, E), lambda i: (i, 0)),
                pl.BlockSpec((E, E), lambda i: (0, 0)),                  # resident
                pl.BlockSpec((1, E), lambda i: (0, 0)),                  # resident
            ],
            out_specs=pl.BlockSpec((tm, E), lambda i: (i, 0)),
        ),
        compiler_params=pltpu.CompilerParams(
            dimension_semantics=("parallel",),
            vmem_limit_bytes=48 * 1024 * 1024),
        cost_estimate=proj_cost,
    )(y, packed["wo"], packed["bo"])
    return out.reshape(B, S, E)


# --------------------------------------------------------------------------- #
# Init + pure-JAX reference (faithful transcription of the torch forward)
# --------------------------------------------------------------------------- #
def init_params(key, embed_dim, num_queries):
    """Deterministic nn.Linear-style init; weights stored as (in, out)."""
    E = embed_dim
    bound = 1.0 / math.sqrt(E)
    keys = jax.random.split(key, 8)

    def u(kk, shape):
        return jax.random.uniform(kk, shape, jnp.float32, minval=-bound, maxval=bound)

    return dict(
        wq=u(keys[0], (num_queries, E, E)),
        bq=u(keys[1], (num_queries, 1, E)),
        wk=u(keys[2], (E, E)),
        bk=u(keys[3], (1, E)),
        wv=u(keys[4], (E, E)),
        bv=u(keys[5], (1, E)),
        wo=u(keys[6], (E, E)),
        bo=u(keys[7], (1, E)),
    )


def reference(x, params, num_heads, num_queries):
    B, S, E = x.shape
    D = E // num_heads
    k = (x @ params["wk"] + params["bk"][0]).reshape(B, S, num_heads, D)
    v = (x @ params["wv"] + params["bv"][0]).reshape(B, S, num_heads, D)
    outs = []
    for qi in range(num_queries):
        q = (x @ params["wq"][qi] + params["bq"][qi, 0]).reshape(B, S, num_heads, D)
        scores = jnp.einsum("bshd,bsgd->bshg", q, k) / math.sqrt(D)
        probs = jax.nn.softmax(scores, axis=-1)
        o = jnp.einsum("bshg,bsgd->bshd", probs, v)
        o = jnp.transpose(o, (0, 2, 1, 3)).reshape(B, S, E)
        outs.append(o)
    y = sum(outs)
    return y @ params["wo"] + params["bo"][0]


if __name__ == "__main__":
    B, S, E, H, NQ = 2, 16, 32, 4, 2   # embed_dim=32, num_heads=4, num_queries=2
    key = jax.random.PRNGKey(0)
    kx, kp = jax.random.split(key)
    x = jax.random.normal(kx, (B, S, E), dtype=jnp.float32)
    params = init_params(kp, E, NQ)
    packed = pack_params(params, H)            # pack + fold scale once

    # small tiles so the test actually exercises multi-step grids / pipelining
    out = multi_query_attention(x, packed, H, seq_tile=8, row_tile=8)
    out = jax.block_until_ready(out)

    ref = reference(x, params, H, NQ)
    assert out.shape == (B, S, E)
    max_err = float(jnp.max(jnp.abs(out - ref)))
    assert max_err < 2e-3, f"mismatch vs reference: max abs err = {max_err}"
    print("KERNEL_OK")
</pallas_src>

<mosaic_0001>
module attributes {stable_mosaic.version = 11 : i64} {
  func.func @_mqa_core_kernel(%arg0: i32, %arg1: i32, %arg2: memref<1x8x32xf32, #tpu.memory_space<vmem>>, %arg3: memref<32x128xf32, #tpu.memory_space<vmem>>, %arg4: memref<1x128xf32, #tpu.memory_space<vmem>>, %arg5: memref<32x4xf32, #tpu.memory_space<vmem>>, %arg6: memref<1x4x8x8xf32, #tpu.memory_space<vmem>>) attributes {dimension_semantics = [#tpu.dimension_semantics<parallel>, #tpu.dimension_semantics<parallel>], iteration_bounds = array<i64: 2, 2>, scalar_prefetch = 0 : i64, scratch_operands = 0 : i64, tpu.core_type = #tpu.core_type<tc>, window_params = [{transform_indices = @transform_0, window_bounds = array<i64: 1, 8, 32>}, {pipeline_mode = #tpu.pipeline_mode<synchronous>, transform_indices = @transform_1, window_bounds = array<i64: 32, 128>}, {pipeline_mode = #tpu.pipeline_mode<synchronous>, transform_indices = @transform_2, window_bounds = array<i64: 1, 128>}, {pipeline_mode = #tpu.pipeline_mode<synchronous>, transform_indices = @transform_3, window_bounds = array<i64: 32, 4>}, {transform_indices = @transform_4, window_bounds = array<i64: 1, 4, 8, 8>}]} {
    %c0 = arith.constant 0 : index
    %c0_0 = arith.constant 0 : index
    %c0_1 = arith.constant 0 : index
    %0 = vector.load %arg2[%c0, %c0_0, %c0_1] : memref<1x8x32xf32, #tpu.memory_space<vmem>>, vector<1x8x32xf32>
    %1 = vector.shape_cast %0 : vector<1x8x32xf32> to vector<8x32xf32>
    %c0_2 = arith.constant 0 : index
    %c0_3 = arith.constant 0 : index
    %2 = vector.load %arg3[%c0_2, %c0_3] : memref<32x128xf32, #tpu.memory_space<vmem>>, vector<32x128xf32>
    %cst = arith.constant dense<0.000000e+00> : vector<8x128xf32>
    %3 = tpu.matmul %1, %2, %cst {dimension_numbers = #tpu.dot_dimension_numbers<[1], [0], [0], [1], [0, 0, 1, 1], [], []>} : vector<8x32xf32>, vector<32x128xf32>, vector<8x128xf32> -> vector<8x128xf32>
    %c0_4 = arith.constant 0 : index
    %c0_5 = arith.constant 0 : index
    %4 = vector.load %arg4[%c0_4, %c0_5] : memref<1x128xf32, #tpu.memory_space<vmem>>, vector<1x128xf32>
    %5 = vector.broadcast %4 : vector<1x128xf32> to vector<8x128xf32>
    %6 = arith.addf %3, %5 : vector<8x128xf32>
    %7 = vector.extract_strided_slice %6 {offsets = [0, 64], sizes = [8, 32], strides = [1, 1]} : vector<8x128xf32> to vector<8x32xf32>
    %8 = vector.extract_strided_slice %6 {offsets = [0, 96], sizes = [8, 32], strides = [1, 1]} : vector<8x128xf32> to vector<8x32xf32>
    %c0_6 = arith.constant 0 : index
    %c0_7 = arith.constant 0 : index
    %9 = vector.load %arg5[%c0_6, %c0_7] : memref<32x4xf32, #tpu.memory_space<vmem>>, vector<32x4xf32>
    %cst_8 = arith.constant 0.000000e+00 : f32
    %10 = vector.broadcast %cst_8 : f32 to vector<8x8xf32>
    %11 = vector.extract_strided_slice %6 {offsets = [0, 0], sizes = [8, 8], strides = [1, 1]} : vector<8x128xf32> to vector<8x8xf32>
    %12 = tpu.concatenate %11, %11, %11, %11 in 1 : vector<8x8xf32>, vector<8x8xf32>, vector<8x8xf32>, vector<8x8xf32> -> vector<8x32xf32>
    %13 = arith.mulf %12, %7 : vector<8x32xf32>
    %cst_9 = arith.constant dense<0.000000e+00> : vector<8x4xf32>
    %14 = tpu.matmul %13, %9, %cst_9 {dimension_numbers = #tpu.dot_dimension_numbers<[1], [0], [0], [1], [0, 0, 1, 1], [], []>} : vector<8x32xf32>, vector<32x4xf32>, vector<8x4xf32> -> vector<8x4xf32>
    %cst_10 = arith.constant dense<0xFF800000> : vector<8xf32>
    %15 = vector.multi_reduction <maximumf>, %14, %cst_10 [1] : vector<8x4xf32> to vector<8xf32>
    %16 = vector.shape_cast %15 : vector<8xf32> to vector<8x1xf32>
    %17 = vector.broadcast %16 : vector<8x1xf32> to vector<8x4xf32>
    %18 = arith.subf %14, %17 : vector<8x4xf32>
    %19 = math.exp %18 : vector<8x4xf32>
    %cst_11 = arith.constant dense<0.000000e+00> : vector<8xf32>
    %20 = vector.multi_reduction <add>, %19, %cst_11 [1] : vector<8x4xf32> to vector<8xf32>
    %21 = vector.shape_cast %20 : vector<8xf32> to vector<8x1xf32>
    %22 = vector.broadcast %21 : vector<8x1xf32> to vector<8x4xf32>
    %23 = arith.divf %19, %22 : vector<8x4xf32>
    %24 = vector.extract_strided_slice %23 {offsets = [0, 0], sizes = [8, 1], strides = [1, 1]} : vector<8x4xf32> to vector<8x1xf32>
    %25 = vector.extract_strided_slice %8 {offsets = [0, 0], sizes = [8, 8], strides = [1, 1]} : vector<8x32xf32> to vector<8x8xf32>
    %26 = vector.broadcast %24 : vector<8x1xf32> to vector<8x8xf32>
    %27 = arith.mulf %26, %25 : vector<8x8xf32>
    %28 = vector.extract_strided_slice %23 {offsets = [0, 1], sizes = [8, 1], strides = [1, 1]} : vector<8x4xf32> to vector<8x1xf32>
    %29 = vector.extract_strided_slice %8 {offsets = [0, 8], sizes = [8, 8], strides = [1, 1]} : vector<8x32xf32> to vector<8x8xf32>
    %30 = vector.broadcast %28 : vector<8x1xf32> to vector<8x8xf32>
    %31 = arith.mulf %30, %29 : vector<8x8xf32>
    %32 = arith.addf %27, %31 : vector<8x8xf32>
    %33 = vector.extract_strided_slice %23 {offsets = [0, 2], sizes = [8, 1], strides = [1, 1]} : vector<8x4xf32> to vector<8x1xf32>
    %34 = vector.extract_strided_slice %8 {offsets = [0, 16], sizes = [8, 8], strides = [1, 1]} : vector<8x32xf32> to vector<8x8xf32>
    %35 = vector.broadcast %33 : vector<8x1xf32> to vector<8x8xf32>
    %36 = arith.mulf %35, %34 : vector<8x8xf32>
    %37 = arith.addf %32, %36 : vector<8x8xf32>
    %38 = vector.extract_strided_slice %23 {offsets = [0, 3], sizes = [8, 1], strides = [1, 1]} : vector<8x4xf32> to vector<8x1xf32>
    %39 = vector.extract_strided_slice %8 {offsets = [0, 24], sizes = [8, 8], strides = [1, 1]} : vector<8x32xf32> to vector<8x8xf32>
    %40 = vector.broadcast %38 : vector<8x1xf32> to vector<8x8xf32>
    %41 = arith.mulf %40, %39 : vector<8x8xf32>
    %42 = arith.addf %37, %41 : vector<8x8xf32>
    %43 = arith.addf %10, %42 : vector<8x8xf32>
    %44 = vector.extract_strided_slice %6 {offsets = [0, 32], sizes = [8, 8], strides = [1, 1]} : vector<8x128xf32> to vector<8x8xf32>
    %45 = tpu.concatenate %44, %44, %44, %44 in 1 : vector<8x8xf32>, vector<8x8xf32>, vector<8x8xf32>, vector<8x8xf32> -> vector<8x32xf32>
    %46 = arith.mulf %45, %7 : vector<8x32xf32>
    %cst_12 = arith.constant dense<0.000000e+00> : vector<8x4xf32>
    %47 = tpu.matmul %46, %9, %cst_12 {dimension_numbers = #tpu.dot_dimension_numbers<[1], [0], [0], [1], [0, 0, 1, 1], [], []>} : vector<8x32xf32>, vector<32x4xf32>, vector<8x4xf32> -> vector<8x4xf32>
    %cst_13 = arith.constant dense<0xFF800000> : vector<8xf32>
    %48 = vector.multi_reduction <maximumf>, %47, %cst_13 [1] : vector<8x4xf32> to vector<8xf32>
    %49 = vector.shape_cast %48 : vector<8xf32> to vector<8x1xf32>
    %50 = vector.broadcast %49 : vector<8x1xf32> to vector<8x4xf32>
    %51 = arith.subf %47, %50 : vector<8x4xf32>
    %52 = math.exp %51 : vector<8x4xf32>
    %cst_14 = arith.constant dense<0.000000e+00> : vector<8xf32>
    %53 = vector.multi_reduction <add>, %52, %cst_14 [1] : vector<8x4xf32> to vector<8xf32>
    %54 = vector.shape_cast %53 : vector<8xf32> to vector<8x1xf32>
    %55 = vector.broadcast %54 : vector<8x1xf32> to vector<8x4xf32>
    %56 = arith.divf %52, %55 : vector<8x4xf32>
    %57 = vector.extract_strided_slice %56 {offsets = [0, 0], sizes = [8, 1], strides = [1, 1]} : vector<8x4xf32> to vector<8x1xf32>
    %58 = vector.extract_strided_slice %8 {offsets = [0, 0], sizes = [8, 8], strides = [1, 1]} : vector<8x32xf32> to vector<8x8xf32>
    %59 = vector.broadcast %57 : vector<8x1xf32> to vector<8x8xf32>
    %60 = arith.mulf %59, %58 : vector<8x8xf32>
    %61 = vector.extract_strided_slice %56 {offsets = [0, 1], sizes = [8, 1], strides = [1, 1]} : vector<8x4xf32> to vector<8x1xf32>
    %62 = vector.extract_strided_slice %8 {offsets = [0, 8], sizes = [8, 8], strides = [1, 1]} : vector<8x32xf32> to vector<8x8xf32>
    %63 = vector.broadcast %61 : vector<8x1xf32> to vector<8x8xf32>
    %64 = arith.mulf %63, %62 : vector<8x8xf32>
    %65 = arith.addf %60, %64 : vector<8x8xf32>
    %66 = vector.extract_strided_slice %56 {offsets = [0, 2], sizes = [8, 1], strides = [1, 1]} : vector<8x4xf32> to vector<8x1xf32>
    %67 = vector.extract_strided_slice %8 {offsets = [0, 16], sizes = [8, 8], strides = [1, 1]} : vector<8x32xf32> to vector<8x8xf32>
    %68 = vector.broadcast %66 : vector<8x1xf32> to vector<8x8xf32>
    %69 = arith.mulf %68, %67 : vector<8x8xf32>
    %70 = arith.addf %65, %69 : vector<8x8xf32>
    %71 = vector.extract_strided_slice %56 {offsets = [0, 3], sizes = [8, 1], strides = [1, 1]} : vector<8x4xf32> to vector<8x1xf32>
    %72 = vector.extract_strided_slice %8 {offsets = [0, 24], sizes = [8, 8], strides = [1, 1]} : vector<8x32xf32> to vector<8x8xf32>
    %73 = vector.broadcast %71 : vector<8x1xf32> to vector<8x8xf32>
    %74 = arith.mulf %73, %72 : vector<8x8xf32>
    %75 = arith.addf %70, %74 : vector<8x8xf32>
    %76 = arith.addf %43, %75 : vector<8x8xf32>
    %c0_15 = arith.constant 0 : index
    %c0_16 = arith.constant 0 : index
    %c0_17 = arith.constant 0 : index
    %c0_18 = arith.constant 0 : index
    %77 = vector.load %arg6[%c0_15, %c0_16, %c0_17, %c0_18] : memref<1x4x8x8xf32, #tpu.memory_space<vmem>>, vector<1x1x8x8xf32>
    %78 = vector.shape_cast %77 : vector<1x1x8x8xf32> to vector<8x8xf32>
    %79 = vector.shape_cast %76 : vector<8x8xf32> to vector<1x1x8x8xf32>
    tpu.vector_store %arg6[%c0_15, %c0_16, %c0_17, %c0_18], %79 {strides = array<i32>} : memref<1x4x8x8xf32, #tpu.memory_space<vmem>>, vector<1x1x8x8xf32>,
    %cst_19 = arith.constant 0.000000e+00 : f32
    %80 = vector.broadcast %cst_19 : f32 to vector<8x8xf32>
    %81 = vector.extract_strided_slice %6 {offsets = [0, 8], sizes = [8, 8], strides = [1, 1]} : vector<8x128xf32> to vector<8x8xf32>
    %82 = tpu.concatenate %81, %81, %81, %81 in 1 : vector<8x8xf32>, vector<8x8xf32>, vector<8x8xf32>, vector<8x8xf32> -> vector<8x32xf32>
    %83 = arith.mulf %82, %7 : vector<8x32xf32>
    %cst_20 = arith.constant dense<0.000000e+00> : vector<8x4xf32>
    %84 = tpu.matmul %83, %9, %cst_20 {dimension_numbers = #tpu.dot_dimension_numbers<[1], [0], [0], [1], [0, 0, 1, 1], [], []>} : vector<8x32xf32>, vector<32x4xf32>, vector<8x4xf32> -> vector<8x4xf32>
    %cst_21 = arith.constant dense<0xFF800000> : vector<8xf32>
    %85 = vector.multi_reduction <maximumf>, %84, %cst_21 [1] : vector<8x4xf32> to vector<8xf32>
    %86 = vector.shape_cast %85 : vector<8xf32> to vector<8x1xf32>
    %87 = vector.broadcast %86 : vector<8x1xf32> to vector<8x4xf32>
    %88 = arith.subf %84, %87 : vector<8x4xf32>
    %89 = math.exp %88 : vector<8x4xf32>
    %cst_22 = arith.constant dense<0.000000e+00> : vector<8xf32>
    %90 = vector.multi_reduction <add>, %89, %cst_22 [1] : vector<8x4xf32> to vector<8xf32>
    %91 = vector.shape_cast %90 : vector<8xf32> to vector<8x1xf32>
    %92 = vector.broadcast %91 : vector<8x1xf32> to vector<8x4xf32>
    %93 = arith.divf %89, %92 : vector<8x4xf32>
    %94 = vector.extract_strided_slice %93 {offsets = [0, 0], sizes = [8, 1], strides = [1, 1]} : vector<8x4xf32> to vector<8x1xf32>
    %95 = vector.extract_strided_slice %8 {offsets = [0, 0], sizes = [8, 8], strides = [1, 1]} : vector<8x32xf32> to vector<8x8xf32>
    %96 = vector.broadcast %94 : vector<8x1xf32> to vector<8x8xf32>
    %97 = arith.mulf %96, %95 : vector<8x8xf32>
    %98 = vector.extract_strided_slice %93 {offsets = [0, 1], sizes = [8, 1], strides = [1, 1]} : vector<8x4xf32> to vector<8x1xf32>
    %99 = vector.extract_strided_slice %8 {offsets = [0, 8], sizes = [8, 8], strides = [1, 1]} : vector<8x32xf32> to vector<8x8xf32>
    %100 = vector.broadcast %98 : vector<8x1xf32> to vector<8x8xf32>
    %101 = arith.mulf %100, %99 : vector<8x8xf32>
    %102 = arith.addf %97, %101 : vector<8x8xf32>
    %103 = vector.extract_strided_slice %93 {offsets = [0, 2], sizes = [8, 1], strides = [1, 1]} : vector<8x4xf32> to vector<8x1xf32>
    %104 = vector.extract_strided_slice %8 {offsets = [0, 16], sizes = [8, 8], strides = [1, 1]} : vector<8x32xf32> to vector<8x8xf32>
    %105 = vector.broadcast %103 : vector<8x1xf32> to vector<8x8xf32>
    %106 = arith.mulf %105, %104 : vector<8x8xf32>
    %107 = arith.addf %102, %106 : vector<8x8xf32>
    %108 = vector.extract_strided_slice %93 {offsets = [0, 3], sizes = [8, 1], strides = [1, 1]} : vector<8x4xf32> to vector<8x1xf32>
    %109 = vector.extract_strided_slice %8 {offsets = [0, 24], sizes = [8, 8], strides = [1, 1]} : vector<8x32xf32> to vector<8x8xf32>
    %110 = vector.broadcast %108 : vector<8x1xf32> to vector<8x8xf32>
    %111 = arith.mulf %110, %109 : vector<8x8xf32>
    %112 = arith.addf %107, %111 : vector<8x8xf32>
    %113 = arith.addf %80, %112 : vector<8x8xf32>
    %114 = vector.extract_strided_slice %6 {offsets = [0, 40], sizes = [8, 8], strides = [1, 1]} : vector<8x128xf32> to vector<8x8xf32>
    %115 = tpu.concatenate %114, %114, %114, %114 in 1 : vector<8x8xf32>, vector<8x8xf32>, vector<8x8xf32>, vector<8x8xf32> -> vector<8x32xf32>
    %116 = arith.mulf %115, %7 : vector<8x32xf32>
    %cst_23 = arith.constant dense<0.000000e+00> : vector<8x4xf32>
    %117 = tpu.matmul %116, %9, %cst_23 {dimension_numbers = #tpu.dot_dimension_numbers<[1], [0], [0], [1], [0, 0, 1, 1], [], []>} : vector<8x32xf32>, vector<32x4xf32>, vector<8x4xf32> -> vector<8x4xf32>
    %cst_24 = arith.constant dense<0xFF800000> : vector<8xf32>
    %118 = vector.multi_reduction <maximumf>, %117, %cst_24 [1] : vector<8x4xf32> to vector<8xf32>
    %119 = vector.shape_cast %118 : vector<8xf32> to vector<8x1xf32>
    %120 = vector.broadcast %119 : vector<8x1xf32> to vector<8x4xf32>
    %121 = arith.subf %117, %120 : vector<8x4xf32>
    %122 = math.exp %121 : vector<8x4xf32>
    %cst_25 = arith.constant dense<0.000000e+00> : vector<8xf32>
    %123 = vector.multi_reduction <add>, %122, %cst_25 [1] : vector<8x4xf32> to vector<8xf32>
    %124 = vector.shape_cast %123 : vector<8xf32> to vector<8x1xf32>
    %125 = vector.broadcast %124 : vector<8x1xf32> to vector<8x4xf32>
    %126 = arith.divf %122, %125 : vector<8x4xf32>
    %127 = vector.extract_strided_slice %126 {offsets = [0, 0], sizes = [8, 1], strides = [1, 1]} : vector<8x4xf32> to vector<8x1xf32>
    %128 = vector.extract_strided_slice %8 {offsets = [0, 0], sizes = [8, 8], strides = [1, 1]} : vector<8x32xf32> to vector<8x8xf32>
    %129 = vector.broadcast %127 : vector<8x1xf32> to vector<8x8xf32>
    %130 = arith.mulf %129, %128 : vector<8x8xf32>
    %131 = vector.extract_strided_slice %126 {offsets = [0, 1], sizes = [8, 1], strides = [1, 1]} : vector<8x4xf32> to vector<8x1xf32>
    %132 = vector.extract_strided_slice %8 {offsets = [0, 8], sizes = [8, 8], strides = [1, 1]} : vector<8x32xf32> to vector<8x8xf32>
    %133 = vector.broadcast %131 : vector<8x1xf32> to vector<8x8xf32>
    %134 = arith.mulf %133, %132 : vector<8x8xf32>
    %135 = arith.addf %130, %134 : vector<8x8xf32>
    %136 = vector.extract_strided_slice %126 {offsets = [0, 2], sizes = [8, 1], strides = [1, 1]} : vector<8x4xf32> to vector<8x1xf32>
    %137 = vector.extract_strided_slice %8 {offsets = [0, 16], sizes = [8, 8], strides = [1, 1]} : vector<8x32xf32> to vector<8x8xf32>
    %138 = vector.broadcast %136 : vector<8x1xf32> to vector<8x8xf32>
    %139 = arith.mulf %138, %137 : vector<8x8xf32>
    %140 = arith.addf %135, %139 : vector<8x8xf32>
    %141 = vector.extract_strided_slice %126 {offsets = [0, 3], sizes = [8, 1], strides = [1, 1]} : vector<8x4xf32> to vector<8x1xf32>
    %142 = vector.extract_strided_slice %8 {offsets = [0, 24], sizes = [8, 8], strides = [1, 1]} : vector<8x32xf32> to vector<8x8xf32>
    %143 = vector.broadcast %141 : vector<8x1xf32> to vector<8x8xf32>
    %144 = arith.mulf %143, %142 : vector<8x8xf32>
    %145 = arith.addf %140, %144 : vector<8x8xf32>
    %146 = arith.addf %113, %145 : vector<8x8xf32>
    %c0_26 = arith.constant 0 : index
    %c1 = arith.constant 1 : index
    %c0_27 = arith.constant 0 : index
    %c0_28 = arith.constant 0 : index
    %147 = vector.load %arg6[%c0_26, %c1, %c0_27, %c0_28] : memref<1x4x8x8xf32, #tpu.memory_space<vmem>>, vector<1x1x8x8xf32>
    %148 = vector.shape_cast %147 : vector<1x1x8x8xf32> to vector<8x8xf32>
    %149 = vector.shape_cast %146 : vector<8x8xf32> to vector<1x1x8x8xf32>
    tpu.vector_store %arg6[%c0_26, %c1, %c0_27, %c0_28], %149 {strides = array<i32>} : memref<1x4x8x8xf32, #tpu.memory_space<vmem>>, vector<1x1x8x8xf32>,
    %cst_29 = arith.constant 0.000000e+00 : f32
    %150 = vector.broadcast %cst_29 : f32 to vector<8x8xf32>
    %151 = vector.extract_strided_slice %6 {offsets = [0, 16], sizes = [8, 8], strides = [1, 1]} : vector<8x128xf32> to vector<8x8xf32>
    %152 = tpu.concatenate %151, %151, %151, %151 in 1 : vector<8x8xf32>, vector<8x8xf32>, vector<8x8xf32>, vector<8x8xf32> -> vector<8x32xf32>
    %153 = arith.mulf %152, %7 : vector<8x32xf32>
    %cst_30 = arith.constant dense<0.000000e+00> : vector<8x4xf32>
    %154 = tpu.matmul %153, %9, %cst_30 {dimension_numbers = #tpu.dot_dimension_numbers<[1], [0], [0], [1], [0, 0, 1, 1], [], []>} : vector<8x32xf32>, vector<32x4xf32>, vector<8x4xf32> -> vector<8x4xf32>
    %cst_31 = arith.constant dense<0xFF800000> : vector<8xf32>
    %155 = vector.multi_reduction <maximumf>, %154, %cst_31 [1] : vector<8x4xf32> to vector<8xf32>
    %156 = vector.shape_cast %155 : vector<8xf32> to vector<8x1xf32>
    %157 = vector.broadcast %156 : vector<8x1xf32> to vector<8x4xf32>
    %158 = arith.subf %154, %157 : vector<8x4xf32>
    %159 = math.exp %158 : vector<8x4xf32>
    %cst_32 = arith.constant dense<0.000000e+00> : vector<8xf32>
    %160 = vector.multi_reduction <add>, %159, %cst_32 [1] : vector<8x4xf32> to vector<8xf32>
    %161 = vector.shape_cast %160 : vector<8xf32> to vector<8x1xf32>
    %162 = vector.broadcast %161 : vector<8x1xf32> to vector<8x4xf32>
    %163 = arith.divf %159, %162 : vector<8x4xf32>
    %164 = vector.extract_strided_slice %163 {offsets = [0, 0], sizes = [8, 1], strides = [1, 1]} : vector<8x4xf32> to vector<8x1xf32>
    %165 = vector.extract_strided_slice %8 {offsets = [0, 0], sizes = [8, 8], strides = [1, 1]} : vector<8x32xf32> to vector<8x8xf32>
    %166 = vector.broadcast %164 : vector<8x1xf32> to vector<8x8xf32>
    %167 = arith.mulf %166, %165 : vector<8x8xf32>
    %168 = vector.extract_strided_slice %163 {offsets = [0, 1], sizes = [8, 1], strides = [1, 1]} : vector<8x4xf32> to vector<8x1xf32>
    %169 = vector.extract_strided_slice %8 {offsets = [0, 8], sizes = [8, 8], strides = [1, 1]} : vector<8x32xf32> to vector<8x8xf32>
    %170 = vector.broadcast %168 : vector<8x1xf32> to vector<8x8xf32>
    %171 = arith.mulf %170, %169 : vector<8x8xf32>
    %172 = arith.addf %167, %171 : vector<8x8xf32>
    %173 = vector.extract_strided_slice %163 {offsets = [0, 2], sizes = [8, 1], strides = [1, 1]} : vector<8x4xf32> to vector<8x1xf32>
    %174 = vector.extract_strided_slice %8 {offsets = [0, 16], sizes = [8, 8], strides = [1, 1]} : vector<8x32xf32> to vector<8x8xf32>
    %175 = vector.broadcast %173 : vector<8x1xf32> to vector<8x8xf32>
    %176 = arith.mulf %175, %174 : vector<8x8xf32>
    %177 = arith.addf %172, %176 : vector<8x8xf32>
    %178 = vector.extract_strided_slice %163 {offsets = [0, 3], sizes = [8, 1], strides = [1, 1]} : vector<8x4xf32> to vector<8x1xf32>
    %179 = vector.extract_strided_slice %8 {offsets = [0, 24], sizes = [8, 8], strides = [1, 1]} : vector<8x32xf32> to vector<8x8xf32>
    %180 = vector.broadcast %178 : vector<8x1xf32> to vector<8x8xf32>
    %181 = arith.mulf %180, %179 : vector<8x8xf32>
    %182 = arith.addf %177, %181 : vector<8x8xf32>
    %183 = arith.addf %150, %182 : vector<8x8xf32>
    %184 = vector.extract_strided_slice %6 {offsets = [0, 48], sizes = [8, 8], strides = [1, 1]} : vector<8x128xf32> to vector<8x8xf32>
    %185 = tpu.concatenate %184, %184, %184, %184 in 1 : vector<8x8xf32>, vector<8x8xf32>, vector<8x8xf32>, vector<8x8xf32> -> vector<8x32xf32>
    %186 = arith.mulf %185, %7 : vector<8x32xf32>
    %cst_33 = arith.constant dense<0.000000e+00> : vector<8x4xf32>
    %187 = tpu.matmul %186, %9, %cst_33 {dimension_numbers = #tpu.dot_dimension_numbers<[1], [0], [0], [1], [0, 0, 1, 1], [], []>} : vector<8x32xf32>, vector<32x4xf32>, vector<8x4xf32> -> vector<8x4xf32>
    %cst_34 = arith.constant dense<0xFF800000> : vector<8xf32>
    %188 = vector.multi_reduction <maximumf>, %187, %cst_34 [1] : vector<8x4xf32> to vector<8xf32>
    %189 = vector.shape_cast %188 : vector<8xf32> to vector<8x1xf32>
    %190 = vector.broadcast %189 : vector<8x1xf32> to vector<8x4xf32>
    %191 = arith.subf %187, %190 : vector<8x4xf32>
    %192 = math.exp %191 : vector<8x4xf32>
    %cst_35 = arith.constant dense<0.000000e+00> : vector<8xf32>
    %193 = vector.multi_reduction <add>, %192, %cst_35 [1] : vector<8x4xf32> to vector<8xf32>
    %194 = vector.shape_cast %193 : vector<8xf32> to vector<8x1xf32>
    %195 = vector.broadcast %194 : vector<8x1xf32> to vector<8x4xf32>
    %196 = arith.divf %192, %195 : vector<8x4xf32>
    %197 = vector.extract_strided_slice %196 {offsets = [0, 0], sizes = [8, 1], strides = [1, 1]} : vector<8x4xf32> to vector<8x1xf32>
    %198 = vector.extract_strided_slice %8 {offsets = [0, 0], sizes = [8, 8], strides = [1, 1]} : vector<8x32xf32> to vector<8x8xf32>
    %199 = vector.broadcast %197 : vector<8x1xf32> to vector<8x8xf32>
    %200 = arith.mulf %199, %198 : vector<8x8xf32>
    %201 = vector.extract_strided_slice %196 {offsets = [0, 1], sizes = [8, 1], strides = [1, 1]} : vector<8x4xf32> to vector<8x1xf32>
    %202 = vector.extract_strided_slice %8 {offsets = [0, 8], sizes = [8, 8], strides = [1, 1]} : vector<8x32xf32> to vector<8x8xf32>
    %203 = vector.broadcast %201 : vector<8x1xf32> to vector<8x8xf32>
    %204 = arith.mulf %203, %202 : vector<8x8xf32>
    %205 = arith.addf %200, %204 : vector<8x8xf32>
    %206 = vector.extract_strided_slice %196 {offsets = [0, 2], sizes = [8, 1], strides = [1, 1]} : vector<8x4xf32> to vector<8x1xf32>
    %207 = vector.extract_strided_slice %8 {offsets = [0, 16], sizes = [8, 8], strides = [1, 1]} : vector<8x32xf32> to vector<8x8xf32>
    %208 = vector.broadcast %206 : vector<8x1xf32> to vector<8x8xf32>
    %209 = arith.mulf %208, %207 : vector<8x8xf32>
    %210 = arith.addf %205, %209 : vector<8x8xf32>
    %211 = vector.extract_strided_slice %196 {offsets = [0, 3], sizes = [8, 1], strides = [1, 1]} : vector<8x4xf32> to vector<8x1xf32>
    %212 = vector.extract_strided_slice %8 {offsets = [0, 24], sizes = [8, 8], strides = [1, 1]} : vector<8x32xf32> to vector<8x8xf32>
    %213 = vector.broadcast %211 : vector<8x1xf32> to vector<8x8xf32>
    %214 = arith.mulf %213, %212 : vector<8x8xf32>
    %215 = arith.addf %210, %214 : vector<8x8xf32>
    %216 = arith.addf %183, %215 : vector<8x8xf32>
    %c0_36 = arith.constant 0 : index
    %c2 = arith.constant 2 : index
    %c0_37 = arith.constant 0 : index
    %c0_38 = arith.constant 0 : index
    %217 = vector.load %arg6[%c0_36, %c2, %c0_37, %c0_38] : memref<1x4x8x8xf32, #tpu.memory_space<vmem>>, vector<1x1x8x8xf32>
    %218 = vector.shape_cast %217 : vector<1x1x8x8xf32> to vector<8x8xf32>
    %219 = vector.shape_cast %216 : vector<8x8xf32> to vector<1x1x8x8xf32>
    tpu.vector_store %arg6[%c0_36, %c2, %c0_37, %c0_38], %219 {strides = array<i32>} : memref<1x4x8x8xf32, #tpu.memory_space<vmem>>, vector<1x1x8x8xf32>,
    %cst_39 = arith.constant 0.000000e+00 : f32
    %220 = vector.broadcast %cst_39 : f32 to vector<8x8xf32>
    %221 = vector.extract_strided_slice %6 {offsets = [0, 24], sizes = [8, 8], strides = [1, 1]} : vector<8x128xf32> to vector<8x8xf32>
    %222 = tpu.concatenate %221, %221, %221, %221 in 1 : vector<8x8xf32>, vector<8x8xf32>, vector<8x8xf32>, vector<8x8xf32> -> vector<8x32xf32>
    %223 = arith.mulf %222, %7 : vector<8x32xf32>
    %cst_40 = arith.constant dense<0.000000e+00> : vector<8x4xf32>
    %224 = tpu.matmul %223, %9, %cst_40 {dimension_numbers = #tpu.dot_dimension_numbers<[1], [0], [0], [1], [0, 0, 1, 1], [], []>} : vector<8x32xf32>, vector<32x4xf32>, vector<8x4xf32> -> vector<8x4xf32>
    %cst_41 = arith.constant dense<0xFF800000> : vector<8xf32>
    %225 = vector.multi_reduction <maximumf>, %224, %cst_41 [1] : vector<8x4xf32> to vector<8xf32>
    %226 = vector.shape_cast %225 : vector<8xf32> to vector<8x1xf32>
    %227 = vector.broadcast %226 : vector<8x1xf32> to vector<8x4xf32>
    %228 = arith.subf %224, %227 : vector<8x4xf32>
    %229 = math.exp %228 : vector<8x4xf32>
    %cst_42 = arith.constant dense<0.000000e+00> : vector<8xf32>
    %230 = vector.multi_reduction <add>, %229, %cst_42 [1] : vector<8x4xf32> to vector<8xf32>
    %231 = vector.shape_cast %230 : vector<8xf32> to vector<8x1xf32>
    %232 = vector.broadcast %231 : vector<8x1xf32> to vector<8x4xf32>
    %233 = arith.divf %229, %232 : vector<8x4xf32>
    %234 = vector.extract_strided_slice %233 {offsets = [0, 0], sizes = [8, 1], strides = [1, 1]} : vector<8x4xf32> to vector<8x1xf32>
    %235 = vector.extract_strided_slice %8 {offsets = [0, 0], sizes = [8, 8], strides = [1, 1]} : vector<8x32xf32> to vector<8x8xf32>
    %236 = vector.broadcast %234 : vector<8x1xf32> to vector<8x8xf32>
    %237 = arith.mulf %236, %235 : vector<8x8xf32>
    %238 = vector.extract_strided_slice %233 {offsets = [0, 1], sizes = [8, 1], strides = [1, 1]} : vector<8x4xf32> to vector<8x1xf32>
    %239 = vector.extract_strided_slice %8 {offsets = [0, 8], sizes = [8, 8], strides = [1, 1]} : vector<8x32xf32> to vector<8x8xf32>
    %240 = vector.broadcast %238 : vector<8x1xf32> to vector<8x8xf32>
    %241 = arith.mulf %240, %239 : vector<8x8xf32>
    %242 = arith.addf %237, %241 : vector<8x8xf32>
    %243 = vector.extract_strided_slice %233 {offsets = [0, 2], sizes = [8, 1], strides = [1, 1]} : vector<8x4xf32> to vector<8x1xf32>
    %244 = vector.extract_strided_slice %8 {offsets = [0, 16], sizes = [8, 8], strides = [1, 1]} : vector<8x32xf32> to vector<8x8xf32>
    %245 = vector.broadcast %243 : vector<8x1xf32> to vector<8x8xf32>
    %246 = arith.mulf %245, %244 : vector<8x8xf32>
    %247 = arith.addf %242, %246 : vector<8x8xf32>
    %248 = vector.extract_strided_slice %233 {offsets = [0, 3], sizes = [8, 1], strides = [1, 1]} : vector<8x4xf32> to vector<8x1xf32>
    %249 = vector.extract_strided_slice %8 {offsets = [0, 24], sizes = [8, 8], strides = [1, 1]} : vector<8x32xf32> to vector<8x8xf32>
    %250 = vector.broadcast %248 : vector<8x1xf32> to vector<8x8xf32>
    %251 = arith.mulf %250, %249 : vector<8x8xf32>
    %252 = arith.addf %247, %251 : vector<8x8xf32>
    %253 = arith.addf %220, %252 : vector<8x8xf32>
    %254 = vector.extract_strided_slice %6 {offsets = [0, 56], sizes = [8, 8], strides = [1, 1]} : vector<8x128xf32> to vector<8x8xf32>
    %255 = tpu.concatenate %254, %254, %254, %254 in 1 : vector<8x8xf32>, vector<8x8xf32>, vector<8x8xf32>, vector<8x8xf32> -> vector<8x32xf32>
    %256 = arith.mulf %255, %7 : vector<8x32xf32>
    %cst_43 = arith.constant dense<0.000000e+00> : vector<8x4xf32>
    %257 = tpu.matmul %256, %9, %cst_43 {dimension_numbers = #tpu.dot_dimension_numbers<[1], [0], [0], [1], [0, 0, 1, 1], [], []>} : vector<8x32xf32>, vector<32x4xf32>, vector<8x4xf32> -> vector<8x4xf32>
    %cst_44 = arith.constant dense<0xFF800000> : vector<8xf32>
    %258 = vector.multi_reduction <maximumf>, %257, %cst_44 [1] : vector<8x4xf32> to vector<8xf32>
    %259 = vector.shape_cast %258 : vector<8xf32> to vector<8x1xf32>
    %260 = vector.broadcast %259 : vector<8x1xf32> to vector<8x4xf32>
    %261 = arith.subf %257, %260 : vector<8x4xf32>
    %262 = math.exp %261 : vector<8x4xf32>
    %cst_45 = arith.constant dense<0.000000e+00> : vector<8xf32>
    %263 = vector.multi_reduction <add>, %262, %cst_45 [1] : vector<8x4xf32> to vector<8xf32>
    %264 = vector.shape_cast %263 : vector<8xf32> to vector<8x1xf32>
    %265 = vector.broadcast %264 : vector<8x1xf32> to vector<8x4xf32>
    %266 = arith.divf %262, %265 : vector<8x4xf32>
    %267 = vector.extract_strided_slice %266 {offsets = [0, 0], sizes = [8, 1], strides = [1, 1]} : vector<8x4xf32> to vector<8x1xf32>
    %268 = vector.extract_strided_slice %8 {offsets = [0, 0], sizes = [8, 8], strides = [1, 1]} : vector<8x32xf32> to vector<8x8xf32>
    %269 = vector.broadcast %267 : vector<8x1xf32> to vector<8x8xf32>
    %270 = arith.mulf %269, %268 : vector<8x8xf32>
    %271 = vector.extract_strided_slice %266 {offsets = [0, 1], sizes = [8, 1], strides = [1, 1]} : vector<8x4xf32> to vector<8x1xf32>
    %272 = vector.extract_strided_slice %8 {offsets = [0, 8], sizes = [8, 8], strides = [1, 1]} : vector<8x32xf32> to vector<8x8xf32>
    %273 = vector.broadcast %271 : vector<8x1xf32> to vector<8x8xf32>
    %274 = arith.mulf %273, %272 : vector<8x8xf32>
    %275 = arith.addf %270, %274 : vector<8x8xf32>
    %276 = vector.extract_strided_slice %266 {offsets = [0, 2], sizes = [8, 1], strides = [1, 1]} : vector<8x4xf32> to vector<8x1xf32>
    %277 = vector.extract_strided_slice %8 {offsets = [0, 16], sizes = [8, 8], strides = [1, 1]} : vector<8x32xf32> to vector<8x8xf32>
    %278 = vector.broadcast %276 : vector<8x1xf32> to vector<8x8xf32>
    %279 = arith.mulf %278, %277 : vector<8x8xf32>
    %280 = arith.addf %275, %279 : vector<8x8xf32>
    %281 = vector.extract_strided_slice %266 {offsets = [0, 3], sizes = [8, 1], strides = [1, 1]} : vector<8x4xf32> to vector<8x1xf32>
    %282 = vector.extract_strided_slice %8 {offsets = [0, 24], sizes = [8, 8], strides = [1, 1]} : vector<8x32xf32> to vector<8x8xf32>
    %283 = vector.broadcast %281 : vector<8x1xf32> to vector<8x8xf32>
    %284 = arith.mulf %283, %282 : vector<8x8xf32>
    %285 = arith.addf %280, %284 : vector<8x8xf32>
    %286 = arith.addf %253, %285 : vector<8x8xf32>
    %c0_46 = arith.constant 0 : index
    %c3 = arith.constant 3 : index
    %c0_47 = arith.constant 0 : index
    %c0_48 = arith.constant 0 : index
    %287 = vector.load %arg6[%c0_46, %c3, %c0_47, %c0_48] : memref<1x4x8x8xf32, #tpu.memory_space<vmem>>, vector<1x1x8x8xf32>
    %288 = vector.shape_cast %287 : vector<1x1x8x8xf32> to vector<8x8xf32>
    %289 = vector.shape_cast %286 : vector<8x8xf32> to vector<1x1x8x8xf32>
    tpu.vector_store %arg6[%c0_46, %c3, %c0_47, %c0_48], %289 {strides = array<i32>} : memref<1x4x8x8xf32, #tpu.memory_space<vmem>>, vector<1x1x8x8xf32>,
    return
  }
  func.func @transform_0(%arg0: i32, %arg1: i32) -> (i32, i32, i32) {
    %c0_i32 = arith.constant 0 : i32
    %c0_i32_0 = arith.constant 0 : i32
    return %arg0, %arg1, %c0_i32 : i32, i32, i32
  }
  func.func @transform_1(%arg0: i32, %arg1: i32) -> (i32, i32) {
    %c0_i32 = arith.constant 0 : i32
    %c0_i32_0 = arith.constant 0 : i32
    %c0_i32_1 = arith.constant 0 : i32
    return %c0_i32, %c0_i32_0 : i32, i32
  }
  func.func @transform_2(%arg0: i32, %arg1: i32) -> (i32, i32) {
    %c0_i32 = arith.constant 0 : i32
    %c0_i32_0 = arith.constant 0 : i32
    %c0_i32_1 = arith.constant 0 : i32
    return %c0_i32, %c0_i32_0 : i32, i32
  }
  func.func @transform_3(%arg0: i32, %arg1: i32) -> (i32, i32) {
    %c0_i32 = arith.constant 0 : i32
    %c0_i32_0 = arith.constant 0 : i32
    %c0_i32_1 = arith.constant 0 : i32
    return %c0_i32, %c0_i32_0 : i32, i32
  }
  func.func @transform_4(%arg0: i32, %arg1: i32) -> (i32, i32, i32, i32) {
    %c0_i32 = arith.constant 0 : i32
    %c0_i32_0 = arith.constant 0 : i32
    %c0_i32_1 = arith.constant 0 : i32
    return %arg0, %c0_i32, %arg1, %c0_i32_0 : i32, i32, i32, i32
  }
}

</mosaic_0001>

<bundles_post_ra>
// kernel: tpu_custom_call.1
= control target key start
LH: loop header
LB: loop body
LE: loop exit
PB: predicated region body
PF: predicated region fallthrough
CT: control target
= control target key end

     0   :  { %9 = vsyncpa [#allocation3], 0  ;;  %s1482_s15 = smov 0   ;;  %s1484_s16 = smov 0   ;;  %s1865_s0 = inlined_call_operand.vmem [shape: f32[2,16,32], index: 0, kind: input, shape index: {}]   ;;  %s1866_s1 = inlined_call_operand.hbm [shape: f32[32,128], index: 1, kind: input, shape index: {}]   ;;  %s1867_s2 = inlined_call_operand.vmem [shape: f32[1,128], index: 2, kind: input, shape index: {}]   ;;  %s1868_s3 = inlined_call_operand.vmem [shape: f32[32,4], index: 3, kind: input, shape index: {}]   ;;  %s1869_s4 = inlined_call_operand.vmem [shape: f32[2,4,16,8], index: 4, kind: output, shape index: {}]  }
   0x1   :  { %s1486_s17 = smov 0   ;;  %s1488_s18 = smov 0  }
   0x2   :  { %s1490_s19 = smov 0   ;;  %s1492_s20 = smov 0  }
   0x3   :  { %s1494_s21 = smov 0  }
   0x4 LB: > { %s1174_s22 = sadd.s32 4294967295, %s1436_s21   ;;  %s24_s23 = sadd.s32 1, %s1428_s19  ;;  %s1436_s21 = sphi %s1494_s21, %s15_s21   ;;  %s1432_s20 = sphi %s1492_s20, %s1878_s20   ;;  %s1428_s19 = sphi %s1490_s19, %s1877_s19   ;;  %s1424_s18 = sphi %s1488_s18, %s1876_s18   ;;  %s1420_s17 = sphi %s1486_s17, %s1875_s17   ;;  %s1416_s16 = sphi %s1484_s16, %s1874_s16   ;;  %s1412_s15 = sphi %s1482_s15, %s1873_s15  }
   0x5   : > { %p25_p0 = scmp.ge.s32.totalorder %s24_s23, 2  ;;  %s27_s24 = sadd.s32 1, %s1432_s20 }
   0x6   : > { %s127_s25 = sadd.s32 1, %s1416_s16  ;;  %p137_p1 = scmp.ne.s32.totalorder %s1416_s16, %s1412_s15 }
   0x7   : > { %s1880_s23 = smov (%p25_p0, %s24_s23), 0  ;;  %s1882_s24 = smov (!%p25_p0, %s27_s24), %s1432_s20 }
   0x8   : > { %s123_s26 = ssub.s32 %s1428_s19, %s1880_s23  ;;  %p138_p2 = scmp.eq.s32.totalorder %s1174_s22, 3 }
   0x9   : > { %p29_p3 = scmp.ge.s32.totalorder %s1882_s24, 2  ;;  %p1176_p4 = scmp.ge.s32.totalorder %s1436_s21, 1 }
   0xa   : > { %p1529_p5 = por %p138_p2, %p137_p1  ;;  %p151_p6 = scmp.lt.s32.totalorder %s1436_s21, 5 }
   0xb   : > { %s1884_s24 = smov (%p29_p3, %s1882_s24), 0  ;;  %p1542_p8 = scmp.eq.s32.totalorder %s1174_s22, 0 }
   0xc   : > { %p1536_p7 = pnand %p1176_p4, %p151_p6  ;;  %s122_s29 = ssub.s32 %s1432_s20, %s1884_s24 }
   0xd   : > { %s124_s5 = sor.u32 %s123_s26, %s122_s29  ;;  %s162_s8 = sshll.u32 %s1866_s1, 4  ;;  %s163_s8 = int_to_ptr.hbm [resolvable:$true] %s162_s8 }
   0xe   : > { %p1205_p9 = pneg %p1536_p7  ;;  %p125_p10 = scmp.eq.s32.totalorder %s124_s5, 0 }
   0xf   : > { %s1438_s10 = smov [#allocation2]   ;;  %s1439_s12 = smov 128  }
  0x10   : > { %s1552_s9 = scalar_select %p125_p10, %s1416_s16, %s127_s25  }
  0x11   : > { %s164_s11 = sshll.u32 %s1438_s10, 4  ;;  %p1206_p11 = pnand %p1542_p8, %p1205_p9  ;;  %s165_s11 = int_to_ptr.vmem [resolvable:$true] %s164_s11 }
  0x12   : > { %s1440_s13 = smov 8   ;;  %197 = sbr.rel (%p1536_p7) target bundleno = 1147 (0x47b), region = 36 }
  0x13   : > { %1208 = dma.hbm_to_vmem [thread:$0]  (!%p1206_p11), %s163_s8, 512, %s165_s11, [#allocation3], %s1439_s12, %s1439_s12, %s1440_s13  }
  0x17   : > { %1407 = dma.done.wait (%p1542_p8), [#allocation3], 512  }
  0x18   : > { %1409 = vsyncadd (%p1542_p8), [#allocation3], 4294966784  ;;  %p226_p12 = scmp.lt.s32.totalorder %s1424_s18, 1  ;;  %p228_p13 = scmp.lt.s32.totalorder %s1420_s17, 1  ;;  %v238_v0 = vld [vmem:[#allocation2 + $0x18] sm:$0xff]  ;;  %v237_v1 = vld [vmem:[#allocation2 + $0x10] sm:$0xff] }
  0x19   : > { %259 = vmatpush.msra.mxu0 %v238_v0  ;;  %v236_v2 = vld [vmem:[#allocation2 + $0x8] sm:$0xff]  ;;  %v235_v3 = vld [vmem:[#allocation2] sm:$0xff]  ;;  %vm243_vm0 = vcmask 261120   ;;  %s1441_s8 = smov 104   ;;  %s1442_s10 = smov 24   ;;  %v270_v8 = vld [vmem:[%s1868_s3 + $0x18] sm:$0xff] }
  0x1a   : > { %s227_s14 = scalar_select %p226_p12, %s1424_s18, 1  ;;  %v1315_v5 = vld [vmem:[%s1867_s2] ss:$0 sm:$0xff]  ;;  %v269_v9 = vld [vmem:[%s1868_s3 + $0x10] sm:$0xff]  ;;  %306 = vmatpush.msra.mxu1 %v270_v8  ;;  %407 = vmatpush.msra.mxu2 %v270_v8  ;;  %v268_v10 = vld [vmem:[%s1868_s3 + $0x8] sm:$0xff]  ;;  %vm281_vm1 = vcmask 64512  }
  0x1b   : > { %s229_s22 = scalar_select %p228_p13, %s1420_s17, 1  ;;  %260 = vmatpush.msra.mxu0 %v237_v1  ;;  %500 = vmatpush.msra.mxu3 %v270_v8  ;;  %v267_v11 = vld [vmem:[%s1868_s3] sm:$0xff]  ;;  %vm283_vm2 = vcmask 130048   ;;  %vm285_vm3 = vcmask 195584   ;;  %vm314_vm4 = vcmask 31744  }
  0x1c   : > { %s1182_s25 = sshll.u32 %s227_s14, 1  ;;  %s1443_s11 = smov 8   ;;  %307 = vmatpush.msra.mxu1 %v269_v9  ;;  %408 = vmatpush.msra.mxu2 %v269_v9 }
  0x1d   : > { %s231_s26 = sadd.s32 %s1182_s25, %s229_s22  ;;  %261 = vmatpush.msra.mxu0 %v236_v2  ;;  %s1444_s12 = smov 64   ;;  %501 = vmatpush.msra.mxu3 %v269_v9 }
  0x1e   : > { %s1183_s29 = sshll.u32 %s231_s26, 3  ;;  %s1445_s13 = smov 16   ;;  %308 = vmatpush.msra.mxu1 %v268_v10  ;;  %409 = vmatpush.msra.mxu2 %v268_v10 }
  0x1f   : > { %s233_s30 = scalar_lea.vmem %s1865_s0, %s1183_s29  ;;  %262 = vmatpush.msra.mxu0 %v235_v3  ;;  %s1446_s14 = smov 96   ;;  %502 = vmatpush.msra.mxu3 %v268_v10 }
  0x20   : > { %v234_v4 = vld [vmem:[%s233_s30] sm:$0xff]  ;;  %s1447_s22 = smov 112   ;;  %s1448_s25 = smov 120   ;;  %309 = vmatpush.msra.mxu1 %v267_v11  ;;  %410 = vmatpush.msra.mxu2 %v267_v11 }
  0x21   : > { %1184 = vmatmul.msk.f32.vlgmr.msra.gmra.mxu0 %vm243_vm0, %v234_v4  ;;  %s1449_s26 = smov 88   ;;  %s1450_s29 = smov 80   ;;  %503 = vmatpush.msra.mxu3 %v267_v11 }
  0x22   : > { %s1451_s28 = smov 72   ;;  %591 = vmatpush.msrb.mxu0 %v270_v8  ;;  %685 = vmatpush.msrb.mxu1 %v270_v8 }
  0x23   : > { %776 = vmatpush.msrb.mxu2 %v270_v8  ;;  %870 = vmatpush.msrb.mxu3 %v270_v8 }
  0x24   : > { %592 = vmatpush.msrb.mxu0 %v269_v9  ;;  %686 = vmatpush.msrb.mxu1 %v269_v9 }
  0x25   : > { %777 = vmatpush.msrb.mxu2 %v269_v9  ;;  %871 = vmatpush.msrb.mxu3 %v269_v9 }
  0x26   : > { %593 = vmatpush.msrb.mxu0 %v268_v10  ;;  %687 = vmatpush.msrb.mxu1 %v268_v10 }
  0x27   : > { %778 = vmatpush.msrb.mxu2 %v268_v10  ;;  %872 = vmatpush.msrb.mxu3 %v268_v10 }
  0x28   : > { %594 = vmatpush.msrb.mxu0 %v267_v11  ;;  %688 = vmatpush.msrb.mxu1 %v267_v11 }
  0x29   : > { %779 = vmatpush.msrb.mxu2 %v267_v11  ;;  %873 = vmatpush.msrb.mxu3 %v267_v11 }
  0x2a   : > { %961 = vmatpush.msra.mxu0 %v270_v8 }
  0x2c   : > { %962 = vmatpush.msra.mxu0 %v269_v9 }
  0x2e   : > { %963 = vmatpush.msra.mxu0 %v268_v10 }
  0x30   : > { %964 = vmatpush.msra.mxu0 %v267_v11 }
  0x9e   : > { %v264_v6 = vpop.f32.mrf.mxu0 }
  0x9f   : > { %v1573_v7 = vadd.f32 %v1315_v5, %v264_v6 }
  0xa1   : > { %379 = vrot.lane.b32.xlu2 %v1573_v7, %s1441_s8  ;;  %278 = vrot.lane.b32.xlu1 %v1573_v7, %s1442_s10 }
  0xa2   : > { %272 = vrot.lane.b32.xlu0 %v1573_v7, %s1443_s11 }
  0xa9   : > { %287 = vrot.lane.b32.xlu1 %v1573_v7, %s1444_s12 }
  0xaa   : > { %275 = vrot.lane.b32.xlu0 %v1573_v7, %s1445_s13 }
  0xb1   : > { %376 = vrot.lane.b32.xlu1 %v1573_v7, %s1446_s14  ;;  %s1456_s14 = smov 32  }
  0xb2   : > { %382 = vrot.lane.b32.xlu0 %v1573_v7, %s1447_s22 }
  0xb9   : > { %385 = vrot.lane.b32.xlu1 %v1573_v7, %s1448_s25 }
  0xba   : > { %569 = vrot.lane.b32.xlu0 %v1573_v7, %s1449_s26 }
  0xc1   : > { %754 = vrot.lane.b32.xlu1 %v1573_v7, %s1450_s29 }
  0xc2   : > { %939 = vrot.lane.b32.xlu0 %v1573_v7, %s1451_s28 }
  0xfb   : > { %v380_v22 = vpop.permute.xlu2 %379 }
 0x113   : > { %v279_v12 = vpop.permute.xlu1 %278 }
 0x114   : > { %v273_v13 = vpop.permute.xlu0 %272 }
 0x115   : > { %v282_v15 = vsel %vm281_vm1, %v1573_v7, %v273_v13 }
 0x11b   : > { %v288_v14 = vpop.permute.xlu1 %287 }
 0x11c   : > { %v276_v16 = vpop.permute.xlu0 %275 }
 0x11d   : > { %v284_v17 = vsel %vm283_vm2, %v282_v15, %v276_v16 }
 0x11e   : > { %v286_v18 = vsel %vm285_vm3, %v284_v17, %v279_v12 }
 0x11f   : > { %v290_v19 = vmul.f32 %v288_v14, %v286_v18 }
 0x121   : > { %1185 = vmatmul.msk.f32.vlgmr.msra.gmra.mxu1 %vm243_vm0, %v290_v19 }
 0x123   : > { %v377_v20 = vpop.permute.xlu1 %376 }
 0x124   : > { %v383_v21 = vpop.permute.xlu0 %382  ;;  %v388_v23 = vsel %vm281_vm1, %v377_v20, %v380_v22 }
 0x125   : > { %v389_v24 = vsel %vm283_vm2, %v388_v23, %v383_v21  ;;  %v851_v41 = vsel %vm281_vm1, %v380_v22, %v383_v21 }
 0x12b   : > { %v386_v25 = vpop.permute.xlu1 %385 }
 0x12c   : > { %v481_v26 = vsel %vm281_vm1, %v386_v25, %v1573_v7  ;;  %v666_v27 = vsel %vm281_vm1, %v383_v21, %v386_v25  ;;  %v570_v28 = vpop.permute.xlu0 %569  ;;  %v390_v29 = vsel %vm285_vm3, %v389_v24, %v386_v25  ;;  %v852_v42 = vsel %vm283_vm2, %v851_v41, %v386_v25 }
 0x12d   : > { %v667_v30 = vsel %vm283_vm2, %v666_v27, %v1573_v7  ;;  %v572_v31 = vsel %vm281_vm1, %v570_v28, %v377_v20  ;;  %v391_v32 = vmul.f32 %v390_v29, %v288_v14  ;;  %v482_v34 = vsel %vm283_vm2, %v481_v26, %v273_v13 }
 0x12e   : > { %v573_v33 = vsel %vm283_vm2, %v572_v31, %v380_v22  ;;  %v668_v35 = vsel %vm285_vm3, %v667_v30, %v273_v13  ;;  %v483_v37 = vsel %vm285_vm3, %v482_v34, %v276_v16  ;;  %v853_v46 = vsel %vm285_vm3, %v852_v42, %v1573_v7 }
 0x12f   : > { %v574_v36 = vsel %vm285_vm3, %v573_v33, %v383_v21  ;;  %1186 = vmatmul.msk.f32.vlgmr.msra.gmra.mxu2 %vm243_vm0, %v391_v32  ;;  %v669_v38 = vmul.f32 %v668_v35, %v288_v14  ;;  %v484_v39 = vmul.f32 %v483_v37, %v288_v14  ;;  %v854_v54 = vmul.f32 %v853_v46, %v288_v14 }
 0x130   : > { %v575_v40 = vmul.f32 %v574_v36, %v288_v14 }
 0x131   : > { %1190 = vmatmul.msk.f32.vlgmr.msrb.gmra.mxu1 %vm243_vm0, %v669_v38  ;;  %1187 = vmatmul.msk.f32.vlgmr.msra.gmra.mxu3 %vm243_vm0, %v484_v39 }
 0x132   : > { %1188 = vmatmul.msk.f32.vlgmr.msrb.gmra.mxu0 %vm243_vm0, %v575_v40 }
 0x133   : > { %v755_v43 = vpop.permute.xlu1 %754 }
 0x134   : > { %v757_v44 = vsel %vm281_vm1, %v755_v43, %v570_v28  ;;  %v940_v45 = vpop.permute.xlu0 %939 }
 0x135   : > { %v758_v47 = vsel %vm283_vm2, %v757_v44, %v377_v20  ;;  %v942_v48 = vsel %vm281_vm1, %v940_v45, %v755_v43 }
 0x136   : > { %v759_v49 = vsel %vm285_vm3, %v758_v47, %v380_v22  ;;  %v943_v50 = vsel %vm283_vm2, %v942_v48, %v570_v28  ;;  %v1452_v48 = vmov 1  }
 0x137   : > { %v760_v51 = vmul.f32 %v759_v49, %v288_v14  ;;  %v944_v52 = vsel %vm285_vm3, %v943_v50, %v377_v20  ;;  %1287 = vset.pattern.permute.xlu1 %v1452_v48  ;;  %v1453_v49 = vmov 0  }
 0x138   : > { %v945_v53 = vmul.f32 %v944_v52, %v288_v14  ;;  %1286 = vset.pattern.permute.xlu0 %v1453_v49  ;;  %1290 = vset.pattern.permute.xlu2 %v1453_v49 }
 0x139   : > { %1191 = vmatmul.msk.f32.vlgmr.msrb.gmra.mxu2 %vm243_vm0, %v760_v51  ;;  %1193 = vmatmul.msk.f32.vlgmr.msrb.gmra.mxu3 %vm243_vm0, %v854_v54 }
 0x13a   : > { %1194 = vmatmul.msk.f32.vlgmr.msra.gmra.mxu0 %vm243_vm0, %v945_v53 }
 0x19e   : > { %v311_v55 = vpop.f32.mrf.mxu1 }
 0x19f   : > { %v315_v56 = vsel %vm314_vm4, %v311_v55, -inf }
 0x1a0   : > { %316 = vmax.xlane.f32.xlu2 %v315_v56 }
 0x1ae   : > { %v690_v63 = vpop.f32.mrf.mxu1 }
 0x1af   : > { %v596_v57 = vpop.f32.mrf.mxu0  ;;  %v693_v1 = vsel %vm314_vm4, %v690_v63, -inf }
 0x1b0   : > { %v599_v58 = vsel %vm314_vm4, %v596_v57, -inf }
 0x1b1   : > { %600 = vmax.xlane.f32.xlu1 %v599_v58 }
 0x1b2   : > { %v412_v59 = vpop.f32.mrf.mxu2 }
 0x1b3   : > { %v415_v60 = vsel %vm314_vm4, %v412_v59, -inf }
 0x1b4   : > { %416 = vmax.xlane.f32.xlu2 %v415_v60  ;;  %v505_v61 = vpop.f32.mrf.mxu3 }
 0x1b5   : > { %v508_v62 = vsel %vm314_vm4, %v505_v61, -inf }
 0x1b6   : > { %509 = vmax.xlane.f32.xlu0 %v508_v62 }
 0x1b7   : > { %v966_v0 = vpop.f32.mrf.mxu0 }
 0x1b8   : > { %v969_v4 = vsel %vm314_vm4, %v966_v0, -inf }
 0x1bc   : > { %694 = vmax.xlane.f32.xlu2 %v693_v1  ;;  %v875_v2 = vpop.f32.mrf.mxu3  ;;  %v781_v5 = vpop.f32.mrf.mxu2 }
 0x1bd   : > { %v878_v3 = vsel %vm314_vm4, %v875_v2, -inf  ;;  %v784_v6 = vsel %vm314_vm4, %v781_v5, -inf }
 0x1be   : > { %879 = vmax.xlane.f32.xlu1 %v878_v3  ;;  %970 = vmax.xlane.f32.xlu0 %v969_v4 }
 0x1c6   : > { %785 = vmax.xlane.f32.xlu0 %v784_v6 }
 0x213   : > { %v317_v8 = vpop.xlane.xlu2 %316 }
 0x214   : > { %v318_v9 = vsub.f32 %v311_v55, %v317_v8 }
 0x216   : > { %v319_v10 = vmul.f32 1.442695, %v318_v9 }
 0x218   : > { %1316 = vpow2.f32 %v319_v10  ;;  %v1454_v10 = vmov 2  }
 0x21e   : > { %v1645_v11 = vpop.eup %1316 }
 0x21f   : > { %v321_v12 = vsel %vm314_vm4, %v1645_v11, 0.0 }
 0x220   : > { %322 = vadd.xlane.f32.xlu2 %v321_v12 }
 0x224   : > { %v601_v13 = vpop.xlane.xlu1 %600 }
 0x225   : > { %v602_v14 = vsub.f32 %v596_v57, %v601_v13 }
 0x227   : > { %v603_v15 = vmul.f32 1.442695, %v602_v14  ;;  %v417_v16 = vpop.xlane.xlu2 %416 }
 0x228   : > { %v418_v17 = vsub.f32 %v412_v59, %v417_v16 }
 0x229   : > { %1318 = vpow2.f32 %v603_v15  ;;  %v510_v19 = vpop.xlane.xlu0 %509 }
 0x22a   : > { %v419_v18 = vmul.f32 1.442695, %v418_v17  ;;  %v511_v20 = vsub.f32 %v505_v61, %v510_v19 }
 0x22c   : > { %1320 = vpow2.f32 %v419_v18  ;;  %v512_v21 = vmul.f32 1.442695, %v511_v20 }
 0x22e   : > { %1322 = vpow2.f32 %v512_v21 }
 0x22f   : > { %v1649_v22 = vpop.eup %1318  ;;  %v695_v23 = vpop.xlane.xlu2 %694 }
 0x230   : > { %v696_v24 = vsub.f32 %v690_v63, %v695_v23  ;;  %v605_v25 = vsel %vm314_vm4, %v1649_v22, 0.0 }
 0x231   : > { %606 = vadd.xlane.f32.xlu0 %v605_v25  ;;  %v880_v28 = vpop.xlane.xlu1 %879  ;;  %v971_v29 = vpop.xlane.xlu0 %970 }
 0x232   : > { %v1653_v26 = vpop.eup %1320  ;;  %v697_v27 = vmul.f32 1.442695, %v696_v24  ;;  %v881_v30 = vsub.f32 %v875_v2, %v880_v28  ;;  %v972_v31 = vsub.f32 %v966_v0, %v971_v29  ;;  %v1455_v29 = vmov 3  }
 0x233   : > { %v421_v32 = vsel %vm314_vm4, %v1653_v26, 0.0 }
 0x234   : > { %1324 = vpow2.f32 %v697_v27  ;;  %422 = vadd.xlane.f32.xlu1 %v421_v32  ;;  %v1657_v33 = vpop.eup %1322  ;;  %v882_v34 = vmul.f32 1.442695, %v881_v30  ;;  %v973_v35 = vmul.f32 1.442695, %v972_v31 }
 0x235   : > { %v514_v36 = vsel %vm314_vm4, %v1657_v33, 0.0 }
 0x236   : > { %1326 = vpow2.f32 %v882_v34  ;;  %515 = vadd.xlane.f32.xlu2 %v514_v36 }
 0x237   : > { %1328 = vpow2.f32 %v973_v35 }
 0x239   : > { %v786_v38 = vpop.xlane.xlu0 %785 }
 0x23a   : > { %v1661_v37 = vpop.eup %1324  ;;  %v787_v39 = vsub.f32 %v781_v5, %v786_v38 }
 0x23b   : > { %v699_v40 = vsel %vm314_vm4, %v1661_v37, 0.0 }
 0x23c   : > { %700 = vadd.xlane.f32.xlu1 %v699_v40  ;;  %v1665_v41 = vpop.eup %1326  ;;  %v788_v42 = vmul.f32 1.442695, %v787_v39 }
 0x23d   : > { %v884_v43 = vsel %vm314_vm4, %v1665_v41, 0.0  ;;  %v1669_v44 = vpop.eup %1328 }
 0x23e   : > { %1330 = vpow2.f32 %v788_v42  ;;  %885 = vadd.xlane.f32.xlu0 %v884_v43  ;;  %v975_v45 = vsel %vm314_vm4, %v1669_v44, 0.0 }
 0x244   : > { %976 = vadd.xlane.f32.xlu1 %v975_v45  ;;  %v1673_v46 = vpop.eup %1330 }
 0x245   : > { %v790_v47 = vsel %vm314_vm4, %v1673_v46, 0.0 }
 0x246   : > { %791 = vadd.xlane.f32.xlu2 %v790_v47 }
 0x293   : > { %v323_v50 = vpop.xlane.xlu2 %322 }
 0x294   : > { %1332 = vrcp.f32 %v323_v50  ;;  %v335_v54 = vand.u32 2147483648, %v323_v50  ;;  %v333_v56 = vand.u32 2147483647, %v323_v50  ;;  %vm329_vm6 = vweird.f32 %v323_v50 }
 0x296   : > { %v336_v58 = vor.u32 1.1754944e-38, %v335_v54  ;;  %vm334_vm8 = vcmp.eq.f32.partialorder %v333_v56, 8.507059e+37 }
 0x29a   : > { %v1333_v51 = vpop.eup %1332 }
 0x29b   : > { %v325_v52 = vmul.f32 %v1333_v51, %v323_v50  ;;  %vm330_vm5 = vweird.f32 %v1333_v51 }
 0x29c   : > { %vm331_vm7 = vmor %vm329_vm6, %vm330_vm5 }
 0x29d   : > { %v326_v53 = vsub.f32 1.0, %v325_v52 }
 0x29f   : > { %v327_v55 = vmul.f32 %v1333_v51, %v326_v53 }
 0x2a1   : > { %v328_v57 = vadd.f32 %v1333_v51, %v327_v55 }
 0x2a3   : > { %v332_v59 = vsel %vm331_vm7, %v1333_v51, %v328_v57 }
 0x2a4   : > { %v607_v60 = vpop.xlane.xlu0 %606  ;;  %v337_v61 = vsel %vm334_vm8, %v336_v58, %v332_v59 }
 0x2a5   : > { %1334 = vrcp.f32 %v607_v60  ;;  %v338_v62 = vmul.f32 %v1645_v11, %v337_v61  ;;  %v619_v5 = vand.u32 2147483648, %v607_v60  ;;  %v617_v9 = vand.u32 2147483647, %v607_v60 }
 0x2a6   : > { %vm613_vm10 = vweird.f32 %v607_v60 }
 0x2a7   : > { %v423_v63 = vpop.xlane.xlu1 %422  ;;  %341 = vperm.xlu0 %1286, %v338_v62   ;;  %346 = vperm.xlu1 %1287, %v338_v62   ;;  %v620_v14 = vor.u32 1.1754944e-38, %v619_v5  ;;  %vm618_vm13 = vcmp.eq.f32.partialorder %v617_v9, 8.507059e+37 }
 0x2a8   : > { %1336 = vrcp.f32 %v423_v63  ;;  %v435_v16 = vand.u32 2147483648, %v423_v63  ;;  %v433_v17 = vand.u32 2147483647, %v423_v63  ;;  %vm429_vm14 = vweird.f32 %v423_v63 }
 0x2a9   : > { %v1681_v0 = vpop.xlane.xlu2 %515 }
 0x2aa   : > { %1338 = vrcp.f32 %v1681_v0  ;;  %v436_v24 = vor.u32 1.1754944e-38, %v435_v16  ;;  %vm434_vm0 = vcmp.eq.f32.partialorder %v433_v17, 8.507059e+37  ;;  %v528_v38 = vand.u32 2147483648, %v1681_v0 }
 0x2ab   : > { %v1335_v1 = vpop.eup %1334  ;;  %vm522_vm3 = vweird.f32 %v1681_v0  ;;  %v526_v39 = vand.u32 2147483647, %v1681_v0 }
 0x2ac   : > { %v609_v2 = vmul.f32 %v1335_v1, %v607_v60  ;;  %vm614_vm9 = vweird.f32 %v1335_v1  ;;  %v529_v47 = vor.u32 1.1754944e-38, %v528_v38 }
 0x2ad   : > { %vm615_vm11 = vmor %vm613_vm10, %vm614_vm9  ;;  %vm527_vm5 = vcmp.eq.f32.partialorder %v526_v39, 8.507059e+37 }
 0x2ae   : > { %v1337_v3 = vpop.eup %1336  ;;  %v610_v4 = vsub.f32 1.0, %v609_v2 }
 0x2af   : > { %v425_v6 = vmul.f32 %v1337_v3, %v423_v63  ;;  %1288 = vset.pattern.permute.xlu1 %v1454_v10  ;;  %vm430_vm12 = vweird.f32 %v1337_v3  ;;  %v1702_v40 = vpop.xlane.xlu1 %700 }
 0x2b0   : > { %v611_v8 = vmul.f32 %v1335_v1, %v610_v4  ;;  %v1339_v11 = vpop.eup %1338  ;;  %356 = vperm.xlu1 %1288, %v338_v62   ;;  %vm431_vm15 = vmor %vm429_vm14, %vm430_vm12  ;;  %v713_v9 = vand.u32 2147483648, %v1702_v40 }
 0x2b1   : > { %v426_v12 = vsub.f32 1.0, %v425_v6  ;;  %v518_v18 = vmul.f32 %v1339_v11, %v1681_v0  ;;  %v1687_v25 = vpop.xlane.xlu0 %885  ;;  %vm523_vm2 = vweird.f32 %v1339_v11 }
 0x2b2   : > { %v612_v13 = vadd.f32 %v1335_v1, %v611_v8  ;;  %1340 = vrcp.f32 %v1687_v25  ;;  %vm524_vm4 = vmor %vm522_vm3, %vm523_vm2 }
 0x2b3   : > { %v427_v15 = vmul.f32 %v1337_v3, %v426_v12  ;;  %v519_v28 = vsub.f32 1.0, %v518_v18 }
 0x2b4   : > { %v616_v19 = vsel %vm615_vm11, %v1335_v1, %v612_v13  ;;  %vm892_vm11 = vweird.f32 %v1687_v25  ;;  %v896_v1 = vand.u32 2147483647, %v1687_v25 }
 0x2b5   : > { %v428_v20 = vadd.f32 %v1337_v3, %v427_v15  ;;  %v621_v21 = vsel %vm618_vm13, %v620_v14, %v616_v19  ;;  %v714_v14 = vor.u32 1.1754944e-38, %v713_v9 }
 0x2b6   : > { %v622_v23 = vmul.f32 %v1649_v22, %v621_v21  ;;  %v520_v22 = vmul.f32 %v1339_v11, %v519_v28  ;;  %vm897_vm13 = vcmp.eq.f32.partialorder %v896_v1, 8.507059e+37 }
 0x2b7   : > { %v432_v27 = vsel %vm431_vm15, %v1337_v3, %v428_v20  ;;  %vm707_vm15 = vweird.f32 %v1702_v40  ;;  %v977_v12 = vpop.xlane.xlu1 %976 }
 0x2b8   : > { %625 = vperm.xlu2 %1290, %v622_v23   ;;  %1289 = vset.pattern.permute.xlu1 %v1455_v29  ;;  %v437_v30 = vsel %vm434_vm0, %v436_v24, %v432_v27  ;;  %v1695_v34 = vpop.eup %1340  ;;  %v521_v35 = vadd.f32 %v1339_v11, %v520_v22  ;;  %v987_v21 = vand.u32 2147483647, %v977_v12 }
 0x2b9   : > { %366 = vperm.xlu1 %1289, %v338_v62   ;;  %v792_v31 = vpop.xlane.xlu2 %791  ;;  %v1692_v32 = vmul.f32 %v1653_v26, %v437_v30  ;;  %v888_v42 = vmul.f32 %v1695_v34, %v1687_v25  ;;  %vm893_vm10 = vweird.f32 %v1695_v34 }
 0x2ba   : > { %1342 = vrcp.f32 %v792_v31  ;;  %v525_v45 = vsel %vm524_vm4, %v1339_v11, %v521_v35  ;;  %v804_v54 = vand.u32 2147483648, %v792_v31  ;;  %vm798_vm7 = vweird.f32 %v792_v31  ;;  %vm894_vm12 = vmor %vm892_vm11, %vm893_vm10 }
 0x2bb   : > { %441 = vperm.xlu0 %1286, %v1692_v32   ;;  %1344 = vrcp.f32 %v1702_v40  ;;  %v530_v51 = vsel %vm527_vm5, %v529_v47, %v525_v45  ;;  %v889_v52 = vsub.f32 1.0, %v888_v42  ;;  %v802_v55 = vand.u32 2147483647, %v792_v31 }
 0x2bc   : > { %v531_v56 = vmul.f32 %v1657_v33, %v530_v51  ;;  %v805_v60 = vor.u32 1.1754944e-38, %v804_v54  ;;  %v898_v33 = vand.u32 2147483648, %v1687_v25  ;;  %v711_v11 = vand.u32 2147483647, %v1702_v40 }
 0x2bd   : > { %v890_v59 = vmul.f32 %v1695_v34, %v889_v52  ;;  %vm803_vm9 = vcmp.eq.f32.partialorder %v802_v55, 8.507059e+37  ;;  %1346 = vrcp.f32 %v977_v12  ;;  %vm983_vm4 = vweird.f32 %v977_v12 }
 0x2be   : > { %v899_v4 = vor.u32 1.1754944e-38, %v898_v33  ;;  %vm712_vm2 = vcmp.eq.f32.partialorder %v711_v11, 8.507059e+37 }
 0x2bf   : > { %v891_v63 = vadd.f32 %v1695_v34, %v890_v59 }
 0x2c0   : > { %1291 = vset.pattern.permute.xlu2 %v1452_v48  ;;  %v1343_v36 = vpop.eup %1342 }
 0x2c1   : > { %630 = vperm.xlu2 %1291, %v622_v23   ;;  %v794_v26 = vmul.f32 %v1343_v36, %v792_v31  ;;  %1292 = vset.pattern.permute.xlu1 %v1454_v10  ;;  %vm799_vm6 = vweird.f32 %v1343_v36  ;;  %v1345_v58 = vpop.eup %1344  ;;  %v895_v3 = vsel %vm894_vm12, %v1695_v34, %v891_v63 }
 0x2c2   : > { %640 = vperm.xlu1 %1292, %v622_v23   ;;  %vm800_vm8 = vmor %vm798_vm7, %vm799_vm6  ;;  %v703_v62 = vmul.f32 %v1345_v58, %v1702_v40  ;;  %v900_v5 = vsel %vm897_vm13, %v899_v4, %v895_v3  ;;  %vm708_vm14 = vweird.f32 %v1345_v58  ;;  %vm988_vm6 = vcmp.eq.f32.partialorder %v987_v21, 8.507059e+37 }
 0x2c3   : > { %v795_v43 = vsub.f32 1.0, %v794_v26  ;;  %1294 = vset.pattern.permute.xlu0 %v1452_v48  ;;  %v901_v6 = vmul.f32 %v1665_v41, %v900_v5  ;;  %vm709_vm0 = vmor %vm707_vm15, %vm708_vm14  ;;  %v1347_v16 = vpop.eup %1346 }
 0x2c4   : > { %446 = vperm.xlu0 %1294, %v1692_v32   ;;  %v704_v2 = vsub.f32 1.0, %v703_v62  ;;  %v979_v17 = vmul.f32 %v1347_v16, %v977_v12  ;;  %vm984_vm3 = vweird.f32 %v1347_v16 }
 0x2c5   : > { %v796_v50 = vmul.f32 %v1343_v36, %v795_v43  ;;  %vm985_vm5 = vmor %vm983_vm4, %vm984_vm3 }
 0x2c6   : > { %v980_v18 = vsub.f32 1.0, %v979_v17 }
 0x2c7   : > { %v797_v53 = vadd.f32 %v1343_v36, %v796_v50 }
 0x2c8   : > { %v981_v19 = vmul.f32 %v1347_v16, %v980_v18 }
 0x2c9   : > { %1293 = vset.pattern.permute.xlu2 %v1455_v29  ;;  %v801_v57 = vsel %vm800_vm8, %v1343_v36, %v797_v53 }
 0x2ca   : > { %650 = vperm.xlu2 %1293, %v622_v23   ;;  %1297 = vset.pattern.permute.xlu1 %v1453_v49  ;;  %v806_v61 = vsel %vm803_vm9, %v805_v60, %v801_v57  ;;  %v982_v20 = vadd.f32 %v1347_v16, %v981_v19 }
 0x2cb   : > { %534 = vperm.xlu1 %1297, %v531_v56   ;;  %v1720_v0 = vmul.f32 %v1673_v46, %v806_v61  ;;  %v705_v46 = vmul.f32 %v1345_v58, %v704_v2 }
 0x2cc   : > { %1295 = vset.pattern.permute.xlu0 %v1454_v10  ;;  %v986_v23 = vsel %vm985_vm5, %v1347_v16, %v982_v20 }
 0x2cd   : > { %456 = vperm.xlu0 %1295, %v1692_v32   ;;  %v706_v8 = vadd.f32 %v1345_v58, %v705_v46 }
 0x2cf   : > { %v710_v13 = vsel %vm709_vm0, %v1345_v58, %v706_v8 }
 0x2d0   : > { %v715_v41 = vsel %vm712_vm2, %v714_v14, %v710_v13 }
 0x2d1   : > { %v716_v15 = vmul.f32 %v1661_v37, %v715_v41  ;;  %v989_v37 = vand.u32 2147483648, %v977_v12 }
 0x2d2   : > { %1308 = vset.pattern.permute.xlu2 %v1453_v49 }
 0x2d3   : > { %810 = vperm.xlu2 %1308, %v1720_v0   ;;  %1298 = vset.pattern.permute.xlu1 %v1452_v48  ;;  %v990_v24 = vor.u32 1.1754944e-38, %v989_v37 }
 0x2d4   : > { %539 = vperm.xlu1 %1298, %v531_v56  }
 0x2d5   : > { %1296 = vset.pattern.permute.xlu0 %v1455_v29  ;;  %v991_v25 = vsel %vm988_vm6, %v990_v24, %v986_v23 }
 0x2d6   : > { %466 = vperm.xlu0 %1296, %v1692_v32   ;;  %v992_v27 = vmul.f32 %v1669_v44, %v991_v25 }
 0x2db   : > { %1310 = vset.pattern.permute.xlu2 %v1452_v48 }
 0x2dc   : > { %909 = vperm.xlu2 %1310, %v901_v6   ;;  %1299 = vset.pattern.permute.xlu1 %v1454_v10 }
 0x2dd   : > { %549 = vperm.xlu1 %1299, %v531_v56  }
 0x2de   : > { %559 = vperm.xlu0 %1296, %v531_v56  }
 0x2e4   : > { %1311 = vset.pattern.permute.xlu2 %v1454_v10 }
 0x2e5   : > { %825 = vperm.xlu2 %1311, %v1720_v0   ;;  %1300 = vset.pattern.permute.xlu1 %v1453_v49 }
 0x2e6   : > { %719 = vperm.xlu1 %1300, %v716_v15   ;;  %1302 = vset.pattern.permute.xlu0 %v1454_v10 }
 0x2e7   : > { %734 = vperm.xlu0 %1302, %v716_v15  }
 0x2ed   : > { %1312 = vset.pattern.permute.xlu2 %v1455_v29 }
 0x2ee   : > { %835 = vperm.xlu2 %1312, %v1720_v0   ;;  %1301 = vset.pattern.permute.xlu1 %v1452_v48 }
 0x2ef   : > { %724 = vperm.xlu1 %1301, %v716_v15   ;;  %919 = vperm.xlu0 %1302, %v901_v6  }
 0x2f6   : > { %1314 = vset.pattern.permute.xlu2 %v1453_v49 }
 0x2f7   : > { %904 = vperm.xlu2 %1314, %v901_v6   ;;  %1303 = vset.pattern.permute.xlu1 %v1455_v29 }
 0x2f8   : > { %1313 = vset.pattern.permute.xlu0 %v1455_v29  ;;  %744 = vperm.xlu1 %1303, %v716_v15  }
 0x2f9   : > { %929 = vperm.xlu0 %1313, %v901_v6  }
 0x300   : > { %1304 = vset.pattern.permute.xlu1 %v1452_v48 }
 0x301   : > { %1000 = vperm.xlu1 %1304, %v992_v27  }
 0x309   : > { %1305 = vset.pattern.permute.xlu1 %v1454_v10 }
 0x30a   : > { %1010 = vperm.xlu1 %1305, %v992_v27  }
 0x312   : > { %1306 = vset.pattern.permute.xlu1 %v1455_v29  ;;  %v1751_v28 = vpop.permute.xlu2 %625 }
 0x313   : > { %1020 = vperm.xlu1 %1306, %v992_v27  }
 0x319   : > { %v347_v30 = vpop.permute.xlu1 %346  ;;  %v1760_v29 = vpop.permute.xlu0 %341 }
 0x31a   : > { %v349_v31 = vmul.f32 %v347_v30, %v1573_v7  ;;  %v344_v25 = vmul.f32 %v1760_v29, %v1573_v7  ;;  %v628_v29 = vmul.f32 %v1751_v28, %v1573_v7 }
 0x31b   : > { %1307 = vset.pattern.permute.xlu1 %v1453_v49  ;;  %v631_v44 = vpop.permute.xlu2 %630 }
 0x31c   : > { %995 = vperm.xlu1 %1307, %v992_v27   ;;  %351 = vrot.lane.b32.xlu2 %v349_v31, %s1448_s25  ;;  %v633_v32 = vmul.f32 %v631_v44, %v1573_v7 }
 0x322   : > { %v357_v22 = vpop.permute.xlu1 %356 }
 0x323   : > { %v359_v10 = vmul.f32 %v357_v22, %v1573_v7 }
 0x324   : > { %1309 = vset.pattern.permute.xlu1 %v1452_v48  ;;  %635 = vrot.lane.b32.xlu2 %v633_v32, %s1448_s25  ;;  %v651_v36 = vpop.permute.xlu2 %650 }
 0x325   : > { %815 = vperm.xlu1 %1309, %v1720_v0   ;;  %361 = vrot.lane.b32.xlu0 %v359_v10, %s1447_s22  ;;  %v653_v42 = vmul.f32 %v651_v36, %v1573_v7 }
 0x32b   : > { %v367_v49 = vpop.permute.xlu1 %366 }
 0x32c   : > { %v369_v34 = vmul.f32 %v367_v49, %v1573_v7 }
 0x32d   : > { %v1765_v35 = vpop.permute.xlu0 %441  ;;  %v1771_v40 = vpop.permute.xlu2 %810 }
 0x32e   : > { %371 = vrot.lane.b32.xlu0 %v369_v34, %s1441_s8  ;;  %v444_v27 = vmul.f32 %v1765_v35, %v1573_v7 }
 0x334   : > { %v641_v38 = vpop.permute.xlu1 %640 }
 0x335   : > { %v643_v39 = vmul.f32 %v641_v38, %v1573_v7 }
 0x336   : > { %v447_v48 = vpop.permute.xlu0 %446  ;;  %v910_v50 = vpop.permute.xlu2 %909 }
 0x337   : > { %645 = vrot.lane.b32.xlu0 %v643_v39, %s1447_s22  ;;  %v449_v26 = vmul.f32 %v447_v48, %v1573_v7  ;;  %v912_v51 = vmul.f32 %v910_v50, %v1573_v7 }
 0x339   : > { %451 = vrot.lane.b32.xlu2 %v449_v26, %s1448_s25 }
 0x33d   : > { %v1775_v43 = vpop.permute.xlu1 %534 }
 0x33e   : > { %v537_v35 = vmul.f32 %v1775_v43, %v1573_v7 }
 0x33f   : > { %655 = vrot.lane.b32.xlu0 %v653_v42, %s1441_s8  ;;  %v457_v45 = vpop.permute.xlu0 %456  ;;  %v826_v11 = vpop.permute.xlu2 %825 }
 0x340   : > { %v459_v47 = vmul.f32 %v457_v45, %v1573_v7  ;;  %v828_v19 = vmul.f32 %v826_v11, %v1573_v7 }
 0x342   : > { %461 = vrot.lane.b32.xlu1 %v459_v47, %s1447_s22 }
 0x346   : > { %v540_v52 = vpop.permute.xlu1 %539 }
 0x347   : > { %914 = vrot.lane.b32.xlu0 %v912_v51, %s1448_s25  ;;  %v542_v53 = vmul.f32 %v540_v52, %v1573_v7 }
 0x348   : > { %v467_v54 = vpop.permute.xlu0 %466  ;;  %v836_v14 = vpop.permute.xlu2 %835 }
 0x349   : > { %v469_v55 = vmul.f32 %v467_v54, %v1573_v7  ;;  %v838_v21 = vmul.f32 %v836_v14, %v1573_v7 }
 0x34a   : > { %544 = vrot.lane.b32.xlu1 %v542_v53, %s1448_s25 }
 0x34b   : > { %471 = vrot.lane.b32.xlu2 %v469_v55, %s1441_s8 }
 0x34f   : > { %v550_v56 = vpop.permute.xlu1 %549 }
 0x350   : > { %v552_v57 = vmul.f32 %v550_v56, %v1573_v7  ;;  %v560_v58 = vpop.permute.xlu0 %559 }
 0x351   : > { %v562_v59 = vmul.f32 %v560_v58, %v1573_v7  ;;  %v905_v15 = vpop.permute.xlu2 %904 }
 0x352   : > { %554 = vrot.lane.b32.xlu1 %v552_v57, %s1447_s22 }
 0x353   : > { %564 = vrot.lane.b32.xlu2 %v562_v59, %s1441_s8 }
 0x358   : > { %v1790_v60 = vpop.permute.xlu1 %719 }
 0x359   : > { %v735_v61 = vpop.permute.xlu0 %734  ;;  %v722_v11 = vmul.f32 %v1790_v60, %v1573_v7 }
 0x35a   : > { %v737_v62 = vmul.f32 %v735_v61, %v1573_v7 }
 0x35c   : > { %739 = vrot.lane.b32.xlu1 %v737_v62, %s1447_s22  ;;  %v907_v62 = vmul.f32 %v905_v15, %v1573_v7 }
 0x361   : > { %v725_v63 = vpop.permute.xlu1 %724  ;;  %v920_v33 = vpop.permute.xlu0 %919 }
 0x362   : > { %v727_v0 = vmul.f32 %v725_v63, %v1573_v7  ;;  %v922_v1 = vmul.f32 %v920_v33, %v1573_v7 }
 0x364   : > { %729 = vrot.lane.b32.xlu2 %v727_v0, %s1448_s25  ;;  %924 = vrot.lane.b32.xlu0 %v922_v1, %s1447_s22 }
 0x36a   : > { %v745_v2 = vpop.permute.xlu1 %744 }
 0x36b   : > { %v930_v3 = vpop.permute.xlu0 %929  ;;  %v747_v4 = vmul.f32 %v745_v2, %v1573_v7 }
 0x36c   : > { %v932_v46 = vmul.f32 %v930_v3, %v1573_v7 }
 0x36d   : > { %749 = vrot.lane.b32.xlu1 %v747_v4, %s1441_s8 }
 0x36e   : > { %934 = vrot.lane.b32.xlu0 %v932_v46, %s1441_s8 }
 0x373   : > { %v1001_v5 = vpop.permute.xlu1 %1000 }
 0x374   : > { %v1003_v6 = vmul.f32 %v1001_v5, %v1573_v7 }
 0x376   : > { %1005 = vrot.lane.b32.xlu1 %v1003_v6, %s1448_s25  ;;  %v352_v18 = vpop.permute.xlu2 %351 }
 0x377   : > { %v354_v30 = vadd.f32 %v352_v18, %v344_v25 }
 0x37c   : > { %v1011_v8 = vpop.permute.xlu1 %1010 }
 0x37d   : > { %v1013_v9 = vmul.f32 %v1011_v8, %v1573_v7 }
 0x37e   : > { %v636_v20 = vpop.permute.xlu2 %635 }
 0x37f   : > { %1015 = vrot.lane.b32.xlu1 %v1013_v9, %s1447_s22  ;;  %v638_v48 = vadd.f32 %v636_v20, %v628_v29  ;;  %v813_v9 = vmul.f32 %v1771_v40, %v1573_v7 }
 0x385   : > { %v1021_v12 = vpop.permute.xlu1 %1020 }
 0x386   : > { %v1023_v13 = vmul.f32 %v1021_v12, %v1573_v7 }
 0x388   : > { %1025 = vrot.lane.b32.xlu1 %v1023_v13, %s1441_s8 }
 0x38e   : > { %v996_v41 = vpop.permute.xlu1 %995 }
 0x38f   : > { %v998_v63 = vmul.f32 %v996_v41, %v1573_v7 }
 0x393   : > { %v452_v23 = vpop.permute.xlu2 %451 }
 0x394   : > { %v454_v31 = vadd.f32 %v452_v23, %v444_v27 }
 0x397   : > { %v816_v16 = vpop.permute.xlu1 %815  ;;  %v362_v37 = vpop.permute.xlu0 %361 }
 0x398   : > { %v818_v17 = vmul.f32 %v816_v16, %v1573_v7  ;;  %v364_v32 = vadd.f32 %v362_v37, %v354_v30 }
 0x39a   : > { %820 = vrot.lane.b32.xlu2 %v818_v17, %s1448_s25 }
 0x3a0   : > { %v372_v24 = vpop.permute.xlu0 %371 }
 0x3a1   : > { %v374_v49 = vadd.f32 %v372_v24, %v364_v32 }
 0x3a2   : > { %830 = vrot.lane.b32.xlu2 %v828_v19, %s1447_s22 }
 0x3a5   : > { %v472_v10 = vpop.permute.xlu2 %471 }
 0x3a9   : > { %v646_v38 = vpop.permute.xlu0 %645 }
 0x3aa   : > { %840 = vrot.lane.b32.xlu2 %v838_v21, %s1441_s8  ;;  %v648_v47 = vadd.f32 %v646_v38, %v638_v48  ;;  %s223_s8 = sand.u32 1, %s1412_s15   ;;  %s1197_s15 = sshll.u32 (%p1529_p5), %s1424_s18, 3 }
 0x3ab   : > { %s1181_s22 = sshll.u32 %s223_s8, 5  ;;  %s1044_s26 = sadd.s32 (%p1529_p5), %s1420_s17, %s1197_s15 }
 0x3ac   : > { %s225_s25 = scalar_lea.vmem [#allocation4], %s1181_s22  ;;  %s1198_s29 = sshll.u32 (%p1529_p5), %s1044_s26, 3 }
 0x3ad   : > { %v565_v51 = vpop.permute.xlu2 %564  ;;  %s1046_s30 = scalar_lea.vmem (%p1529_p5), %s1869_s4, %s1198_s29 }
 0x3b1   : > { %v656_v42 = vpop.permute.xlu0 %655 }
 0x3b2   : > { %v658_v52 = vadd.f32 %v656_v42, %v648_v47 }
 0x3b4   : > { %v462_v44 = vpop.permute.xlu1 %461 }
 0x3b5   : > { %v464_v22 = vadd.f32 %v462_v44, %v454_v31 }
 0x3b7   : > { %v474_v34 = vadd.f32 %v472_v10, %v464_v22 }
 0x3b9   : > { %v475_v36 = vadd.f32 %v474_v34, %v374_v49  ;;  %v915_v57 = vpop.permute.xlu0 %914 }
 0x3ba   : > { %v917_v33 = vadd.f32 %v915_v57, %v907_v62 }
 0x3bb   : > { %477 = vrot.lane.b32.xlu2 %v475_v36, %s1456_s14 }
 0x3bc   : > { %v545_v39 = vpop.permute.xlu1 %544 }
 0x3bd   : > { %v547_v26 = vadd.f32 %v545_v39, %v537_v35 }
 0x3be   : > { %v730_v28 = vpop.permute.xlu2 %729 }
 0x3bf   : > { %v732_v12 = vadd.f32 %v730_v28, %v722_v11 }
 0x3c4   : > { %v555_v45 = vpop.permute.xlu1 %554 }
 0x3c5   : > { %v557_v50 = vadd.f32 %v555_v45, %v547_v26 }
 0x3c7   : > { %v567_v53 = vadd.f32 %v565_v51, %v557_v50 }
 0x3c9   : > { %v659_v54 = vadd.f32 %v658_v52, %v567_v53 }
 0x3cb   : > { %661 = vrot.lane.b32.xlu0 %v659_v54, %s1456_s14 }
 0x3ce   : > { %v740_v55 = vpop.permute.xlu1 %739 }
 0x3cf   : > { %v742_v14 = vadd.f32 %v740_v55, %v732_v12 }
 0x3d6   : > { %v925_v59 = vpop.permute.xlu0 %924 }
 0x3d7   : > { %v927_v2 = vadd.f32 %v925_v59, %v917_v33 }
 0x3df   : > { %v750_v56 = vpop.permute.xlu1 %749 }
 0x3e0   : > { %v935_v1 = vpop.permute.xlu0 %934  ;;  %v752_v16 = vadd.f32 %v750_v56, %v742_v14 }
 0x3e1   : > { %v937_v46 = vadd.f32 %v935_v1, %v927_v2 }
 0x3e8   : > { %v1006_v58 = vpop.permute.xlu1 %1005 }
 0x3e9   : > { %v1008_v0 = vadd.f32 %v1006_v58, %v998_v63 }
 0x3f1   : > { %v1016_v61 = vpop.permute.xlu1 %1015 }
 0x3f2   : > { %v1018_v3 = vadd.f32 %v1016_v61, %v1008_v0 }
 0x3f4   : > { %v821_v43 = vpop.permute.xlu2 %820 }
 0x3f5   : > { %v823_v13 = vadd.f32 %v821_v43, %v813_v9 }
 0x3fa   : > { %v1026_v4 = vpop.permute.xlu1 %1025 }
 0x3fb   : > { %v1028_v5 = vadd.f32 %v1026_v4, %v1018_v3 }
 0x3fc   : > { %v831_v6 = vpop.permute.xlu2 %830 }
 0x3fd   : > { %v1029_v8 = vadd.f32 %v1028_v5, %v937_v46  ;;  %v833_v41 = vadd.f32 %v831_v6, %v823_v13 }
 0x3ff   : > { %1031 = vrot.lane.b32.xlu0 %v1029_v8, %s1456_s14 }
 0x404   : > { %v841_v15 = vpop.permute.xlu2 %840 }
 0x405   : > { %v843_v17 = vadd.f32 %v841_v15, %v833_v41 }
 0x407   : > { %v844_v18 = vadd.f32 %v843_v17, %v752_v16 }
 0x409   : > { %846 = vrot.lane.b32.xlu2 %v844_v18, %s1456_s14 }
 0x415   : > { %v478_v19 = vpop.permute.xlu2 %477 }
 0x416   : > { %480 = vst.msk [vmem:[%s225_s25] sm:$0xff] %vm281_vm1, %v478_v19 }
 0x41d   : > { %v1081_v20 = vld [vmem:[%s225_s25] sm:$0xff] (%p1529_p5) }
 0x41e   : > { %1082 = vst [vmem:[%s1046_s30] sm:$0xff] (%p1529_p5), %v1081_v20 }
 0x43d   : > { %v662_v40 = vpop.permute.xlu0 %661 }
 0x43e   : > { %1189 = vst.msk [vmem:[%s225_s25 + $0x8] sm:$0xff] %vm281_vm1, %v662_v40 }
 0x445   : > { %v1083_v37 = vld [vmem:[%s225_s25 + $0x8] sm:$0xff] (%p1529_p5) }
 0x446   : > { %1084 = vst [vmem:[%s1046_s30 + $0x10] sm:$0xff] (%p1529_p5), %v1083_v37 }
 0x463   : > { %v847_v7 = vpop.permute.xlu2 %846 }
 0x464   : > { %1192 = vst.msk [vmem:[%s225_s25 + $0x10] sm:$0xff] %vm281_vm1, %v847_v7 }
 0x46b   : > { %v1085_v21 = vld [vmem:[%s225_s25 + $0x10] sm:$0xff] (%p1529_p5) }
 0x46c   : > { %1086 = vst [vmem:[%s1046_s30 + $0x20] sm:$0xff] (%p1529_p5), %v1085_v21 }
 0x46e   : > { %1042 = sbr.rel (!%p1529_p5) target bundleno = 1147 (0x47b), region = 44 }
 0x471   : > { %v1032_v60 = vpop.permute.xlu0 %1031 }
 0x472   : > { %1195 = vst.msk [vmem:[%s225_s25 + $0x18] sm:$0xff] %vm281_vm1, %v1032_v60 }
 0x479   : > { %v1087_v23 = vld [vmem:[%s225_s25 + $0x18] sm:$0xff] }
 0x47a   : > { %1088 = vst [vmem:[%s1046_s30 + $0x30] sm:$0xff] %v1087_v23 }
 0x47b PF: > { %s15_s21 = sadd.s32 1, %s1436_s21   ;;  %s1873_s15 = smov %s1416_s16 }
 0x47c   : > { %p12_p0 = scmp.ge.s32.totalorder %s15_s21, 6   ;;  %s1874_s16 = smov %s1552_s9 }
 0x47d   : > { %s1875_s17 = smov %s1428_s19  ;;  %s1876_s18 = smov %s1432_s20 }
 0x47e   : > { %s1877_s19 = smov %s1880_s23  ;;  %s1878_s20 = smov %s1884_s24 }
 0x47f   :  { %14 = sbr.rel (!%p12_p0) target bundleno = 4 (0x4), region = 112 }
 0x484   :  { %1104 = vsyncpa [#allocation3], 1 }
 0x485   :  { %1106 = vsyncpa [#allocation3 + $0x1], 1 }

</bundles_post_ra>
